<compile_context>
chip_gen: v5e
topology: v5e:2x2
jax: 0.10.0
libtpu: 0.0.40
codegen_flags: <defaults>
</compile_context>

<pallas_src>
import functools

import jax
import jax.numpy as jnp
from jax import lax
from jax.experimental import pallas as pl
from jax.experimental.pallas import tpu as pltpu


_LN_EPS = 1e-5  # torch.nn.LayerNorm default


def _round_up(n, m):
    return ((n + m - 1) // m) * m


def _cdiv(a, b):
    return -(-a // b)


def _layernorm(h, gamma, beta):
    mu = jnp.mean(h, axis=-1, keepdims=True)
    var = jnp.mean(jnp.square(h - mu), axis=-1, keepdims=True)
    return (h - mu) * lax.rsqrt(var + _LN_EPS) * gamma + beta


def _swish(h):
    return h * jax.nn.sigmoid(h)


def _upblock_kernel(din, td, cd, has_attn, xtc_ref, *refs):
    if has_attn:
        (g1, be1, w1t, b1t,
         g2, be2, w2c, b2c,
         g3, be3, w3s, b3s,
         wv, bv, wo, bo, o_ref) = refs
    else:
        (g1, be1, w1t, b1t,
         g2, be2, w2c, b2c,
         g3, be3, w3s, b3s, o_ref) = refs

    f32 = jnp.float32
    bf16 = jnp.bfloat16

    packed = xtc_ref[...].astype(f32)                 # (TB, din+td+cd)
    x = packed[:, :din]
    t = packed[:, din:din + td]
    c = packed[:, din + td:din + td + cd]

    # --- ResidualBlock, with the small-K dots fused along the contraction ---
    # lin1(sw(ln1(x))) + time_emb(sw(t))  ==  [sw(ln1(x)) | sw(t)] @ [w1; wt]
    a1 = jnp.concatenate([_swish(_layernorm(x, g1[...], be1[...])), _swish(t)],
                         axis=-1)
    h = jnp.dot(a1.astype(bf16), w1t[...], preferred_element_type=f32) + b1t[...]

    # lin2(sw(ln2(h))) + cond_emb(sw(cond))
    a2 = jnp.concatenate([_swish(_layernorm(h, g2[...], be2[...])), _swish(c)],
                         axis=-1)
    h = jnp.dot(a2.astype(bf16), w2c[...], preferred_element_type=f32) + b2c[...]

    # lin3(sw(ln3(h))) + shortcut(x)
    a3 = jnp.concatenate([_swish(_layernorm(h, g3[...], be3[...])), x], axis=-1)
    res = jnp.dot(a3.astype(bf16), w3s[...], preferred_element_type=f32) + b3s[...]

    # --- AttentionBlock (n_heads=1, seq_len=1) ---
    # Softmax over the single key is exactly 1 => context == value projection;
    # q and k are never computed (dead code removed in the wrapper).
    if has_attn:
        v = jnp.dot(res.astype(bf16), wv[...], preferred_element_type=f32) + bv[...]
        res = jnp.dot(v.astype(bf16), wo[...], preferred_element_type=f32) + bo[...] + res

    o_ref[...] = res.astype(o_ref.dtype)


def upblock_forward(params, x, t, cond, *, has_attn, block_batch=None):
    """UpBlock forward.  x:(B, in_dim+out_dim), t:(B, time_dim), cond:(B, cond_dim)."""
    b, din = x.shape
    td = t.shape[1]
    cd = cond.shape[1]
    dout = params["w1"].shape[1]
    out_dtype = x.dtype
    f32 = jnp.float32
    wdtype = jnp.bfloat16        # native MXU operand dtype; accumulation stays f32

    def row(p):
        return jnp.asarray(p, f32).reshape(1, -1)

    # ---- fold / prepare weights once, outside the kernel ----
    w1t = jnp.concatenate([params["w1"], params["wt"]], axis=0).astype(wdtype)
    b1t = row(params["b1"] + params["bt"])
    w2c = jnp.concatenate([params["w2"], params["wc"]], axis=0).astype(wdtype)
    b2c = row(params["b2"] + params["bc"])
    w3s = jnp.concatenate([params["w3"], params["ws"]], axis=0).astype(wdtype)
    b3s = row(params["b3"] + params["bs"])

    weights = [row(params["g1"]), row(params["be1"]), w1t, b1t,
               row(params["g2"]), row(params["be2"]), w2c, b2c,
               row(params["g3"]), row(params["be3"]), w3s, b3s]
    if has_attn:
        # seq_len == 1 => q/k are dead; ship only the value chunk (3x less
        # projection FLOPs / VMEM, and no unaligned lane-slice in the kernel).
        wv = params["wp"][:, 2 * dout:3 * dout].astype(wdtype)
        bv = row(params["bp"][2 * dout:3 * dout])
        weights += [wv, bv, params["wo"].astype(wdtype), row(params["bo"])]

    # ---- pack x / t / cond into a single lane-dense input ----
    xtc = jnp.concatenate(
        [x, t.astype(out_dtype), cond.astype(out_dtype)], axis=-1)
    W = din + td + cd

    # ---- batch tiling: intermediate-aware, fits every TPU generation ----
    sub = 16 if out_dtype == jnp.bfloat16 else 8
    io_item = jnp.dtype(out_dtype).itemsize
    row_io = 2 * (W + dout) * io_item                        # dbl-buffered in/out tiles
    row_f32 = 4 * (2 * W + 2 * din + 6 * dout + td + cd)     # live f32 intermediates
    if block_batch is None:
        act_budget = 12 << 20                                # keeps totals well under 32 MiB
        block_batch = max(sub, min(1024, act_budget // max(row_io + row_f32, 1)))
    block_batch = max(sub, (block_batch // sub) * sub)

    b_sub = _round_up(b, sub)
    if block_batch >= b_sub and b_sub >= 2 * sub:
        # guarantee >=2 grid steps so "parallel" can shard across both
        # TensorCores of a v7x chip.
        block_batch = _round_up(_cdiv(b_sub, 2), sub)
    n_blocks = _cdiv(b_sub, block_batch)
    tb = _round_up(_cdiv(b, n_blocks), sub)
    padded_b = n_blocks * tb

    if padded_b != b:                       # gated: no-pad path is copy-free
        xtc = jnp.pad(xtc, ((0, padded_b - b), (0, 0)))

    # ---- explicit VMEM budget (weights single-buffered, activations x2) ----
    weight_bytes = sum(int(w.size) * jnp.dtype(w.dtype).itemsize for w in weights)
    act_bytes = tb * (row_io + row_f32)
    vmem_limit = int(min(48 << 20,
                         max(32 << 20, 2 * weight_bytes + act_bytes + (4 << 20))))

    kernel = functools.partial(_upblock_kernel, din, td, cd, has_attn)

    def build(weight_pipeline_mode):
        wspecs = []
        for w in weights:
            if weight_pipeline_mode is None:
                wspecs.append(pl.BlockSpec(w.shape, lambda i: (0, 0)))
            else:
                wspecs.append(pl.BlockSpec(w.shape, lambda i: (0, 0),
                                           pipeline_mode=weight_pipeline_mode))
        return pl.pallas_call(
            kernel,
            out_shape=jax.ShapeDtypeStruct((padded_b, dout), out_dtype),
            grid_spec=pltpu.PrefetchScalarGridSpec(
                num_scalar_prefetch=0,
                grid=(n_blocks,),
                in_specs=[pl.BlockSpec((tb, W), lambda i: (i, 0))] + wspecs,
                out_specs=pl.BlockSpec((tb, dout), lambda i: (i, 0)),
            ),
            compiler_params=pltpu.CompilerParams(
                dimension_semantics=("parallel",),
                vmem_limit_bytes=vmem_limit),
        )

    try:
        # Constant index_map => weights fetched once; single-buffer them so the
        # resident weight footprint is not doubled.
        out = build(pl.Buffered(1))(xtc, *weights)
    except Exception:  # fallback if this jax rejects pipeline_mode / Buffered(1)
        out = build(None)(xtc, *weights)

    if padded_b != b:                       # gated: only slice if we padded
        out = out[:b]
    return out


# ----------------------------- reference & test -----------------------------

def _init_params(key, in_dim, out_dim, time_dim, cond_dim, has_attn):
    din = in_dim + out_dim  # ResidualBlock input dim (skip-concat dim in the UNet)

    def lin(k, fan_in, fan_out):
        bound = 1.0 / (fan_in ** 0.5)
        kw, kb = jax.random.split(k)
        w = jax.random.uniform(kw, (fan_in, fan_out), jnp.float32, -bound, bound)
        bias = jax.random.uniform(kb, (fan_out,), jnp.float32, -bound, bound)
        return w, bias

    keys = jax.random.split(key, 16)
    p = {}
    p["g1"] = 1.0 + 0.1 * jax.random.normal(keys[0], (din,), jnp.float32)
    p["be1"] = 0.1 * jax.random.normal(keys[1], (din,), jnp.float32)
    p["w1"], p["b1"] = lin(keys[2], din, out_dim)
    p["wt"], p["bt"] = lin(keys[3], time_dim, out_dim)
    p["g2"] = 1.0 + 0.1 * jax.random.normal(keys[4], (out_dim,), jnp.float32)
    p["be2"] = 0.1 * jax.random.normal(keys[5], (out_dim,), jnp.float32)
    p["w2"], p["b2"] = lin(keys[6], out_dim, out_dim)
    p["wc"], p["bc"] = lin(keys[7], cond_dim, out_dim)
    p["g3"] = 1.0 + 0.1 * jax.random.normal(keys[8], (out_dim,), jnp.float32)
    p["be3"] = 0.1 * jax.random.normal(keys[9], (out_dim,), jnp.float32)
    p["w3"], p["b3"] = lin(keys[10], out_dim, out_dim)
    p["ws"], p["bs"] = lin(keys[11], din, out_dim)
    if has_attn:
        p["wp"], p["bp"] = lin(keys[12], out_dim, 3 * out_dim)
        p["wo"], p["bo"] = lin(keys[13], out_dim, out_dim)
    return p


def upblock_ref(params, x, t, cond, *, has_attn):
    """Plain-JAX reference mirroring the PyTorch forward exactly."""
    prec = lax.Precision.HIGHEST

    def ln(h, g, bb):
        mu = jnp.mean(h, axis=-1, keepdims=True)
        var = jnp.mean(jnp.square(h - mu), axis=-1, keepdims=True)
        return (h - mu) * lax.rsqrt(var + _LN_EPS) * g + bb

    sw = lambda h: h * jax.nn.sigmoid(h)

    h = jnp.dot(sw(ln(x, params["g1"], params["be1"])), params["w1"], precision=prec) + params["b1"]
    h = h + jnp.dot(sw(t), params["wt"], precision=prec) + params["bt"]
    h = jnp.dot(sw(ln(h, params["g2"], params["be2"])), params["w2"], precision=prec) + params["b2"]
    h = h + jnp.dot(sw(cond), params["wc"], precision=prec) + params["bc"]
    h = jnp.dot(sw(ln(h, params["g3"], params["be3"])), params["w3"], precision=prec) + params["b3"]
    res = h + jnp.dot(x, params["ws"], precision=prec) + params["bs"]

    if has_attn:
        d_k = params["wo"].shape[0]
        bsz = res.shape[0]
        xs = res[:, None, :]                                         # (B, 1, D)
        qkv = jnp.einsum("bse,ef->bsf", xs, params["wp"], precision=prec) + params["bp"]
        qkv = qkv.reshape(bsz, -1, 1, 3 * d_k)                       # n_heads = 1
        q, k, v = jnp.split(qkv, 3, axis=-1)
        attn = jnp.einsum("bihd,bjhd->bijh", q, k, precision=prec) * (d_k ** -0.5)
        attn = jax.nn.softmax(attn, axis=2)
        r = jnp.einsum("bijh,bjhd->bihd", attn, v, precision=prec)
        r = r.reshape(bsz, -1, d_k)
        r = jnp.einsum("bse,ef->bsf", r, params["wo"], precision=prec) + params["bo"]
        res = (r + xs)[:, 0, :]
    return res


if __name__ == "__main__":
    in_dim, out_dim, time_dim, cond_dim = 16, 32, 8, 8
    batch = 4

    key = jax.random.PRNGKey(0)
    kp, kx, kt, kc = jax.random.split(key, 4)

    din = in_dim + out_dim  # UpBlock's ResidualBlock consumes the skip-concat width
    x = jax.random.normal(kx, (batch, din), jnp.float32)
    t = jax.random.normal(kt, (batch, time_dim), jnp.float32)
    cond = jax.random.normal(kc, (batch, cond_dim), jnp.float32)

    for has_attn in (True, False):
        params = _init_params(kp, in_dim, out_dim, time_dim, cond_dim, has_attn)

        y = jax.block_until_ready(
            upblock_forward(params, x, t, cond, has_attn=has_attn))
        y_ref = upblock_ref(params, x, t, cond, has_attn=has_attn)

        assert y.shape == (batch, out_dim) and y.dtype == x.dtype
        err = float(jnp.max(jnp.abs(y - y_ref)))
        # bf16 MXU operands (f32 accumulate) vs a HIGHEST-precision f32 reference.
        assert jnp.allclose(y, y_ref, atol=2e-2, rtol=2e-2), err

    print("KERNEL_OK")
</pallas_src>

<mosaic_0001>
module attributes {stable_mosaic.version = 11 : i64} {
  func.func @_upblock_kernel(%arg0: i32, %arg1: memref<8x64xf32, #tpu.memory_space<vmem>>, %arg2: memref<1x48xf32, #tpu.memory_space<vmem>>, %arg3: memref<1x48xf32, #tpu.memory_space<vmem>>, %arg4: memref<56x32xbf16, #tpu.memory_space<vmem>>, %arg5: memref<1x32xf32, #tpu.memory_space<vmem>>, %arg6: memref<1x32xf32, #tpu.memory_space<vmem>>, %arg7: memref<1x32xf32, #tpu.memory_space<vmem>>, %arg8: memref<40x32xbf16, #tpu.memory_space<vmem>>, %arg9: memref<1x32xf32, #tpu.memory_space<vmem>>, %arg10: memref<1x32xf32, #tpu.memory_space<vmem>>, %arg11: memref<1x32xf32, #tpu.memory_space<vmem>>, %arg12: memref<80x32xbf16, #tpu.memory_space<vmem>>, %arg13: memref<1x32xf32, #tpu.memory_space<vmem>>, %arg14: memref<32x32xbf16, #tpu.memory_space<vmem>>, %arg15: memref<1x32xf32, #tpu.memory_space<vmem>>, %arg16: memref<32x32xbf16, #tpu.memory_space<vmem>>, %arg17: memref<1x32xf32, #tpu.memory_space<vmem>>, %arg18: memref<8x32xf32, #tpu.memory_space<vmem>>) attributes {dimension_semantics = [#tpu.dimension_semantics<parallel>], iteration_bounds = array<i64: 1>, scalar_prefetch = 0 : i64, scratch_operands = 0 : i64, tpu.core_type = #tpu.core_type<tc>, window_params = [{transform_indices = @transform_0, window_bounds = array<i64: 8, 64>}, {pipeline_mode = #tpu.pipeline_mode<synchronous>, transform_indices = @transform_1, window_bounds = array<i64: 1, 48>}, {pipeline_mode = #tpu.pipeline_mode<synchronous>, transform_indices = @transform_2, window_bounds = array<i64: 1, 48>}, {pipeline_mode = #tpu.pipeline_mode<synchronous>, transform_indices = @transform_3, window_bounds = array<i64: 56, 32>}, {pipeline_mode = #tpu.pipeline_mode<synchronous>, transform_indices = @transform_4, window_bounds = array<i64: 1, 32>}, {pipeline_mode = #tpu.pipeline_mode<synchronous>, transform_indices = @transform_5, window_bounds = array<i64: 1, 32>}, {pipeline_mode = #tpu.pipeline_mode<synchronous>, transform_indices = @transform_6, window_bounds = array<i64: 1, 32>}, {pipeline_mode = #tpu.pipeline_mode<synchronous>, transform_indices = @transform_7, window_bounds = array<i64: 40, 32>}, {pipeline_mode = #tpu.pipeline_mode<synchronous>, transform_indices = @transform_8, window_bounds = array<i64: 1, 32>}, {pipeline_mode = #tpu.pipeline_mode<synchronous>, transform_indices = @transform_9, window_bounds = array<i64: 1, 32>}, {pipeline_mode = #tpu.pipeline_mode<synchronous>, transform_indices = @transform_10, window_bounds = array<i64: 1, 32>}, {pipeline_mode = #tpu.pipeline_mode<synchronous>, transform_indices = @transform_11, window_bounds = array<i64: 80, 32>}, {pipeline_mode = #tpu.pipeline_mode<synchronous>, transform_indices = @transform_12, window_bounds = array<i64: 1, 32>}, {pipeline_mode = #tpu.pipeline_mode<synchronous>, transform_indices = @transform_13, window_bounds = array<i64: 32, 32>}, {pipeline_mode = #tpu.pipeline_mode<synchronous>, transform_indices = @transform_14, window_bounds = array<i64: 1, 32>}, {pipeline_mode = #tpu.pipeline_mode<synchronous>, transform_indices = @transform_15, window_bounds = array<i64: 32, 32>}, {pipeline_mode = #tpu.pipeline_mode<synchronous>, transform_indices = @transform_16, window_bounds = array<i64: 1, 32>}, {transform_indices = @transform_17, window_bounds = array<i64: 8, 32>}]} {
    %c0 = arith.constant 0 : index
    %c0_0 = arith.constant 0 : index
    %0 = vector.load %arg1[%c0, %c0_0] : memref<8x64xf32, #tpu.memory_space<vmem>>, vector<8x64xf32>
    %1 = vector.extract_strided_slice %0 {offsets = [0, 0], sizes = [8, 48], strides = [1, 1]} : vector<8x64xf32> to vector<8x48xf32>
    %2 = vector.extract_strided_slice %0 {offsets = [0, 48], sizes = [8, 8], strides = [1, 1]} : vector<8x64xf32> to vector<8x8xf32>
    %3 = vector.extract_strided_slice %0 {offsets = [0, 56], sizes = [8, 8], strides = [1, 1]} : vector<8x64xf32> to vector<8x8xf32>
    %c0_1 = arith.constant 0 : index
    %c0_2 = arith.constant 0 : index
    %4 = vector.load %arg2[%c0_1, %c0_2] : memref<1x48xf32, #tpu.memory_space<vmem>>, vector<1x48xf32>
    %c0_3 = arith.constant 0 : index
    %c0_4 = arith.constant 0 : index
    %5 = vector.load %arg3[%c0_3, %c0_4] : memref<1x48xf32, #tpu.memory_space<vmem>>, vector<1x48xf32>
    %cst = arith.constant dense<0.000000e+00> : vector<8xf32>
    %6 = vector.multi_reduction <add>, %1, %cst [1] : vector<8x48xf32> to vector<8xf32>
    %7 = vector.shape_cast %6 : vector<8xf32> to vector<8x1xf32>
    %cst_5 = arith.constant 4.800000e+01 : f32
    %8 = vector.broadcast %cst_5 : f32 to vector<8x1xf32>
    %9 = arith.divf %7, %8 : vector<8x1xf32>
    %10 = vector.broadcast %9 : vector<8x1xf32> to vector<8x48xf32>
    %11 = arith.subf %1, %10 : vector<8x48xf32>
    %12 = arith.mulf %11, %11 : vector<8x48xf32>
    %cst_6 = arith.constant dense<0.000000e+00> : vector<8xf32>
    %13 = vector.multi_reduction <add>, %12, %cst_6 [1] : vector<8x48xf32> to vector<8xf32>
    %14 = vector.shape_cast %13 : vector<8xf32> to vector<8x1xf32>
    %cst_7 = arith.constant 4.800000e+01 : f32
    %15 = vector.broadcast %cst_7 : f32 to vector<8x1xf32>
    %16 = arith.divf %14, %15 : vector<8x1xf32>
    %17 = vector.broadcast %9 : vector<8x1xf32> to vector<8x48xf32>
    %18 = arith.subf %1, %17 : vector<8x48xf32>
    %cst_8 = arith.constant 9.99999974E-6 : f32
    %19 = vector.broadcast %cst_8 : f32 to vector<8x1xf32>
    %20 = arith.addf %16, %19 : vector<8x1xf32>
    %21 = math.rsqrt %20 : vector<8x1xf32>
    %22 = vector.broadcast %21 : vector<8x1xf32> to vector<8x48xf32>
    %23 = arith.mulf %18, %22 : vector<8x48xf32>
    %24 = vector.broadcast %4 : vector<1x48xf32> to vector<8x48xf32>
    %25 = arith.mulf %23, %24 : vector<8x48xf32>
    %26 = vector.broadcast %5 : vector<1x48xf32> to vector<8x48xf32>
    %27 = arith.addf %25, %26 : vector<8x48xf32>
    %28 = arith.negf %27 : vector<8x48xf32>
    %29 = math.exp %28 : vector<8x48xf32>
    %cst_9 = arith.constant 1.000000e+00 : f32
    %30 = vector.broadcast %cst_9 : f32 to vector<8x48xf32>
    %31 = arith.addf %30, %29 : vector<8x48xf32>
    %32 = arith.divf %30, %31 : vector<8x48xf32>
    %33 = arith.mulf %27, %32 : vector<8x48xf32>
    %34 = arith.negf %2 : vector<8x8xf32>
    %35 = math.exp %34 : vector<8x8xf32>
    %cst_10 = arith.constant 1.000000e+00 : f32
    %36 = vector.broadcast %cst_10 : f32 to vector<8x8xf32>
    %37 = arith.addf %36, %35 : vector<8x8xf32>
    %38 = arith.divf %36, %37 : vector<8x8xf32>
    %39 = arith.mulf %2, %38 : vector<8x8xf32>
    %40 = tpu.concatenate %33, %39 in 1 : vector<8x48xf32>, vector<8x8xf32> -> vector<8x56xf32>
    %41 = arith.truncf %40 : vector<8x56xf32> to vector<8x56xbf16>
    %c0_11 = arith.constant 0 : index
    %c0_12 = arith.constant 0 : index
    %42 = vector.load %arg4[%c0_11, %c0_12] : memref<56x32xbf16, #tpu.memory_space<vmem>>, vector<56x32xbf16>
    %cst_13 = arith.constant dense<0.000000e+00> : vector<8x32xf32>
    %43 = tpu.matmul %41, %42, %cst_13 {dimension_numbers = #tpu.dot_dimension_numbers<[1], [0], [0], [1], [0, 0, 1, 1], [], []>} : vector<8x56xbf16>, vector<56x32xbf16>, vector<8x32xf32> -> vector<8x32xf32>
    %c0_14 = arith.constant 0 : index
    %c0_15 = arith.constant 0 : index
    %44 = vector.load %arg5[%c0_14, %c0_15] : memref<1x32xf32, #tpu.memory_space<vmem>>, vector<1x32xf32>
    %45 = vector.broadcast %44 : vector<1x32xf32> to vector<8x32xf32>
    %46 = arith.addf %43, %45 : vector<8x32xf32>
    %c0_16 = arith.constant 0 : index
    %c0_17 = arith.constant 0 : index
    %47 = vector.load %arg6[%c0_16, %c0_17] : memref<1x32xf32, #tpu.memory_space<vmem>>, vector<1x32xf32>
    %c0_18 = arith.constant 0 : index
    %c0_19 = arith.constant 0 : index
    %48 = vector.load %arg7[%c0_18, %c0_19] : memref<1x32xf32, #tpu.memory_space<vmem>>, vector<1x32xf32>
    %cst_20 = arith.constant dense<0.000000e+00> : vector<8xf32>
    %49 = vector.multi_reduction <add>, %46, %cst_20 [1] : vector<8x32xf32> to vector<8xf32>
    %50 = vector.shape_cast %49 : vector<8xf32> to vector<8x1xf32>
    %cst_21 = arith.constant 3.200000e+01 : f32
    %51 = vector.broadcast %cst_21 : f32 to vector<8x1xf32>
    %52 = arith.divf %50, %51 : vector<8x1xf32>
    %53 = vector.broadcast %52 : vector<8x1xf32> to vector<8x32xf32>
    %54 = arith.subf %46, %53 : vector<8x32xf32>
    %55 = arith.mulf %54, %54 : vector<8x32xf32>
    %cst_22 = arith.constant dense<0.000000e+00> : vector<8xf32>
    %56 = vector.multi_reduction <add>, %55, %cst_22 [1] : vector<8x32xf32> to vector<8xf32>
    %57 = vector.shape_cast %56 : vector<8xf32> to vector<8x1xf32>
    %cst_23 = arith.constant 3.200000e+01 : f32
    %58 = vector.broadcast %cst_23 : f32 to vector<8x1xf32>
    %59 = arith.divf %57, %58 : vector<8x1xf32>
    %60 = vector.broadcast %52 : vector<8x1xf32> to vector<8x32xf32>
    %61 = arith.subf %46, %60 : vector<8x32xf32>
    %cst_24 = arith.constant 9.99999974E-6 : f32
    %62 = vector.broadcast %cst_24 : f32 to vector<8x1xf32>
    %63 = arith.addf %59, %62 : vector<8x1xf32>
    %64 = math.rsqrt %63 : vector<8x1xf32>
    %65 = vector.broadcast %64 : vector<8x1xf32> to vector<8x32xf32>
    %66 = arith.mulf %61, %65 : vector<8x32xf32>
    %67 = vector.broadcast %47 : vector<1x32xf32> to vector<8x32xf32>
    %68 = arith.mulf %66, %67 : vector<8x32xf32>
    %69 = vector.broadcast %48 : vector<1x32xf32> to vector<8x32xf32>
    %70 = arith.addf %68, %69 : vector<8x32xf32>
    %71 = arith.negf %70 : vector<8x32xf32>
    %72 = math.exp %71 : vector<8x32xf32>
    %cst_25 = arith.constant 1.000000e+00 : f32
    %73 = vector.broadcast %cst_25 : f32 to vector<8x32xf32>
    %74 = arith.addf %73, %72 : vector<8x32xf32>
    %75 = arith.divf %73, %74 : vector<8x32xf32>
    %76 = arith.mulf %70, %75 : vector<8x32xf32>
    %77 = arith.negf %3 : vector<8x8xf32>
    %78 = math.exp %77 : vector<8x8xf32>
    %cst_26 = arith.constant 1.000000e+00 : f32
    %79 = vector.broadcast %cst_26 : f32 to vector<8x8xf32>
    %80 = arith.addf %79, %78 : vector<8x8xf32>
    %81 = arith.divf %79, %80 : vector<8x8xf32>
    %82 = arith.mulf %3, %81 : vector<8x8xf32>
    %83 = tpu.concatenate %76, %82 in 1 : vector<8x32xf32>, vector<8x8xf32> -> vector<8x40xf32>
    %84 = arith.truncf %83 : vector<8x40xf32> to vector<8x40xbf16>
    %c0_27 = arith.constant 0 : index
    %c0_28 = arith.constant 0 : index
    %85 = vector.load %arg8[%c0_27, %c0_28] : memref<40x32xbf16, #tpu.memory_space<vmem>>, vector<40x32xbf16>
    %cst_29 = arith.constant dense<0.000000e+00> : vector<8x32xf32>
    %86 = tpu.matmul %84, %85, %cst_29 {dimension_numbers = #tpu.dot_dimension_numbers<[1], [0], [0], [1], [0, 0, 1, 1], [], []>} : vector<8x40xbf16>, vector<40x32xbf16>, vector<8x32xf32> -> vector<8x32xf32>
    %c0_30 = arith.constant 0 : index
    %c0_31 = arith.constant 0 : index
    %87 = vector.load %arg9[%c0_30, %c0_31] : memref<1x32xf32, #tpu.memory_space<vmem>>, vector<1x32xf32>
    %88 = vector.broadcast %87 : vector<1x32xf32> to vector<8x32xf32>
    %89 = arith.addf %86, %88 : vector<8x32xf32>
    %c0_32 = arith.constant 0 : index
    %c0_33 = arith.constant 0 : index
    %90 = vector.load %arg10[%c0_32, %c0_33] : memref<1x32xf32, #tpu.memory_space<vmem>>, vector<1x32xf32>
    %c0_34 = arith.constant 0 : index
    %c0_35 = arith.constant 0 : index
    %91 = vector.load %arg11[%c0_34, %c0_35] : memref<1x32xf32, #tpu.memory_space<vmem>>, vector<1x32xf32>
    %cst_36 = arith.constant dense<0.000000e+00> : vector<8xf32>
    %92 = vector.multi_reduction <add>, %89, %cst_36 [1] : vector<8x32xf32> to vector<8xf32>
    %93 = vector.shape_cast %92 : vector<8xf32> to vector<8x1xf32>
    %cst_37 = arith.constant 3.200000e+01 : f32
    %94 = vector.broadcast %cst_37 : f32 to vector<8x1xf32>
    %95 = arith.divf %93, %94 : vector<8x1xf32>
    %96 = vector.broadcast %95 : vector<8x1xf32> to vector<8x32xf32>
    %97 = arith.subf %89, %96 : vector<8x32xf32>
    %98 = arith.mulf %97, %97 : vector<8x32xf32>
    %cst_38 = arith.constant dense<0.000000e+00> : vector<8xf32>
    %99 = vector.multi_reduction <add>, %98, %cst_38 [1] : vector<8x32xf32> to vector<8xf32>
    %100 = vector.shape_cast %99 : vector<8xf32> to vector<8x1xf32>
    %cst_39 = arith.constant 3.200000e+01 : f32
    %101 = vector.broadcast %cst_39 : f32 to vector<8x1xf32>
    %102 = arith.divf %100, %101 : vector<8x1xf32>
    %103 = vector.broadcast %95 : vector<8x1xf32> to vector<8x32xf32>
    %104 = arith.subf %89, %103 : vector<8x32xf32>
    %cst_40 = arith.constant 9.99999974E-6 : f32
    %105 = vector.broadcast %cst_40 : f32 to vector<8x1xf32>
    %106 = arith.addf %102, %105 : vector<8x1xf32>
    %107 = math.rsqrt %106 : vector<8x1xf32>
    %108 = vector.broadcast %107 : vector<8x1xf32> to vector<8x32xf32>
    %109 = arith.mulf %104, %108 : vector<8x32xf32>
    %110 = vector.broadcast %90 : vector<1x32xf32> to vector<8x32xf32>
    %111 = arith.mulf %109, %110 : vector<8x32xf32>
    %112 = vector.broadcast %91 : vector<1x32xf32> to vector<8x32xf32>
    %113 = arith.addf %111, %112 : vector<8x32xf32>
    %114 = arith.negf %113 : vector<8x32xf32>
    %115 = math.exp %114 : vector<8x32xf32>
    %cst_41 = arith.constant 1.000000e+00 : f32
    %116 = vector.broadcast %cst_41 : f32 to vector<8x32xf32>
    %117 = arith.addf %116, %115 : vector<8x32xf32>
    %118 = arith.divf %116, %117 : vector<8x32xf32>
    %119 = arith.mulf %113, %118 : vector<8x32xf32>
    %120 = tpu.concatenate %119, %1 in 1 : vector<8x32xf32>, vector<8x48xf32> -> vector<8x80xf32>
    %121 = arith.truncf %120 : vector<8x80xf32> to vector<8x80xbf16>
    %c0_42 = arith.constant 0 : index
    %c0_43 = arith.constant 0 : index
    %122 = vector.load %arg12[%c0_42, %c0_43] : memref<80x32xbf16, #tpu.memory_space<vmem>>, vector<80x32xbf16>
    %cst_44 = arith.constant dense<0.000000e+00> : vector<8x32xf32>
    %123 = tpu.matmul %121, %122, %cst_44 {dimension_numbers = #tpu.dot_dimension_numbers<[1], [0], [0], [1], [0, 0, 1, 1], [], []>} : vector<8x80xbf16>, vector<80x32xbf16>, vector<8x32xf32> -> vector<8x32xf32>
    %c0_45 = arith.constant 0 : index
    %c0_46 = arith.constant 0 : index
    %124 = vector.load %arg13[%c0_45, %c0_46] : memref<1x32xf32, #tpu.memory_space<vmem>>, vector<1x32xf32>
    %125 = vector.broadcast %124 : vector<1x32xf32> to vector<8x32xf32>
    %126 = arith.addf %123, %125 : vector<8x32xf32>
    %127 = arith.truncf %126 : vector<8x32xf32> to vector<8x32xbf16>
    %c0_47 = arith.constant 0 : index
    %c0_48 = arith.constant 0 : index
    %128 = vector.load %arg14[%c0_47, %c0_48] : memref<32x32xbf16, #tpu.memory_space<vmem>>, vector<32x32xbf16>
    %cst_49 = arith.constant dense<0.000000e+00> : vector<8x32xf32>
    %129 = tpu.matmul %127, %128, %cst_49 {dimension_numbers = #tpu.dot_dimension_numbers<[1], [0], [0], [1], [0, 0, 1, 1], [], []>} : vector<8x32xbf16>, vector<32x32xbf16>, vector<8x32xf32> -> vector<8x32xf32>
    %c0_50 = arith.constant 0 : index
    %c0_51 = arith.constant 0 : index
    %130 = vector.load %arg15[%c0_50, %c0_51] : memref<1x32xf32, #tpu.memory_space<vmem>>, vector<1x32xf32>
    %131 = vector.broadcast %130 : vector<1x32xf32> to vector<8x32xf32>
    %132 = arith.addf %129, %131 : vector<8x32xf32>
    %133 = arith.truncf %132 : vector<8x32xf32> to vector<8x32xbf16>
    %c0_52 = arith.constant 0 : index
    %c0_53 = arith.constant 0 : index
    %134 = vector.load %arg16[%c0_52, %c0_53] : memref<32x32xbf16, #tpu.memory_space<vmem>>, vector<32x32xbf16>
    %cst_54 = arith.constant dense<0.000000e+00> : vector<8x32xf32>
    %135 = tpu.matmul %133, %134, %cst_54 {dimension_numbers = #tpu.dot_dimension_numbers<[1], [0], [0], [1], [0, 0, 1, 1], [], []>} : vector<8x32xbf16>, vector<32x32xbf16>, vector<8x32xf32> -> vector<8x32xf32>
    %c0_55 = arith.constant 0 : index
    %c0_56 = arith.constant 0 : index
    %136 = vector.load %arg17[%c0_55, %c0_56] : memref<1x32xf32, #tpu.memory_space<vmem>>, vector<1x32xf32>
    %137 = vector.broadcast %136 : vector<1x32xf32> to vector<8x32xf32>
    %138 = arith.addf %135, %137 : vector<8x32xf32>
    %139 = arith.addf %138, %126 : vector<8x32xf32>
    %c0_57 = arith.constant 0 : index
    %c0_58 = arith.constant 0 : index
    %140 = vector.load %arg18[%c0_57, %c0_58] : memref<8x32xf32, #tpu.memory_space<vmem>>, vector<8x32xf32>
    tpu.vector_store %arg18[%c0_57, %c0_58], %139 {strides = array<i32>} : memref<8x32xf32, #tpu.memory_space<vmem>>, vector<8x32xf32>,
    return
  }
  func.func @transform_0(%arg0: i32) -> (i32, i32) {
    %c0_i32 = arith.constant 0 : i32
    %c0_i32_0 = arith.constant 0 : i32
    return %arg0, %c0_i32 : i32, i32
  }
  func.func @transform_1(%arg0: i32) -> (i32, i32) {
    %c0_i32 = arith.constant 0 : i32
    %c0_i32_0 = arith.constant 0 : i32
    %c0_i32_1 = arith.constant 0 : i32
    return %c0_i32, %c0_i32_0 : i32, i32
  }
  func.func @transform_2(%arg0: i32) -> (i32, i32) {
    %c0_i32 = arith.constant 0 : i32
    %c0_i32_0 = arith.constant 0 : i32
    %c0_i32_1 = arith.constant 0 : i32
    return %c0_i32, %c0_i32_0 : i32, i32
  }
  func.func @transform_3(%arg0: i32) -> (i32, i32) {
    %c0_i32 = arith.constant 0 : i32
    %c0_i32_0 = arith.constant 0 : i32
    %c0_i32_1 = arith.constant 0 : i32
    return %c0_i32, %c0_i32_0 : i32, i32
  }
  func.func @transform_4(%arg0: i32) -> (i32, i32) {
    %c0_i32 = arith.constant 0 : i32
    %c0_i32_0 = arith.constant 0 : i32
    %c0_i32_1 = arith.constant 0 : i32
    return %c0_i32, %c0_i32_0 : i32, i32
  }
  func.func @transform_5(%arg0: i32) -> (i32, i32) {
    %c0_i32 = arith.constant 0 : i32
    %c0_i32_0 = arith.constant 0 : i32
    %c0_i32_1 = arith.constant 0 : i32
    return %c0_i32, %c0_i32_0 : i32, i32
  }
  func.func @transform_6(%arg0: i32) -> (i32, i32) {
    %c0_i32 = arith.constant 0 : i32
    %c0_i32_0 = arith.constant 0 : i32
    %c0_i32_1 = arith.constant 0 : i32
    return %c0_i32, %c0_i32_0 : i32, i32
  }
  func.func @transform_7(%arg0: i32) -> (i32, i32) {
    %c0_i32 = arith.constant 0 : i32
    %c0_i32_0 = arith.constant 0 : i32
    %c0_i32_1 = arith.constant 0 : i32
    return %c0_i32, %c0_i32_0 : i32, i32
  }
  func.func @transform_8(%arg0: i32) -> (i32, i32) {
    %c0_i32 = arith.constant 0 : i32
    %c0_i32_0 = arith.constant 0 : i32
    %c0_i32_1 = arith.constant 0 : i32
    return %c0_i32, %c0_i32_0 : i32, i32
  }
  func.func @transform_9(%arg0: i32) -> (i32, i32) {
    %c0_i32 = arith.constant 0 : i32
    %c0_i32_0 = arith.constant 0 : i32
    %c0_i32_1 = arith.constant 0 : i32
    return %c0_i32, %c0_i32_0 : i32, i32
  }
  func.func @transform_10(%arg0: i32) -> (i32, i32) {
    %c0_i32 = arith.constant 0 : i32
    %c0_i32_0 = arith.constant 0 : i32
    %c0_i32_1 = arith.constant 0 : i32
    return %c0_i32, %c0_i32_0 : i32, i32
  }
  func.func @transform_11(%arg0: i32) -> (i32, i32) {
    %c0_i32 = arith.constant 0 : i32
    %c0_i32_0 = arith.constant 0 : i32
    %c0_i32_1 = arith.constant 0 : i32
    return %c0_i32, %c0_i32_0 : i32, i32
  }
  func.func @transform_12(%arg0: i32) -> (i32, i32) {
    %c0_i32 = arith.constant 0 : i32
    %c0_i32_0 = arith.constant 0 : i32
    %c0_i32_1 = arith.constant 0 : i32
    return %c0_i32, %c0_i32_0 : i32, i32
  }
  func.func @transform_13(%arg0: i32) -> (i32, i32) {
    %c0_i32 = arith.constant 0 : i32
    %c0_i32_0 = arith.constant 0 : i32
    %c0_i32_1 = arith.constant 0 : i32
    return %c0_i32, %c0_i32_0 : i32, i32
  }
  func.func @transform_14(%arg0: i32) -> (i32, i32) {
    %c0_i32 = arith.constant 0 : i32
    %c0_i32_0 = arith.constant 0 : i32
    %c0_i32_1 = arith.constant 0 : i32
    return %c0_i32, %c0_i32_0 : i32, i32
  }
  func.func @transform_15(%arg0: i32) -> (i32, i32) {
    %c0_i32 = arith.constant 0 : i32
    %c0_i32_0 = arith.constant 0 : i32
    %c0_i32_1 = arith.constant 0 : i32
    return %c0_i32, %c0_i32_0 : i32, i32
  }
  func.func @transform_16(%arg0: i32) -> (i32, i32) {
    %c0_i32 = arith.constant 0 : i32
    %c0_i32_0 = arith.constant 0 : i32
    %c0_i32_1 = arith.constant 0 : i32
    return %c0_i32, %c0_i32_0 : i32, i32
  }
  func.func @transform_17(%arg0: i32) -> (i32, i32) {
    %c0_i32 = arith.constant 0 : i32
    %c0_i32_0 = arith.constant 0 : i32
    return %arg0, %c0_i32 : i32, i32
  }
}

module attributes {stable_mosaic.version = 11 : i64} {
  func.func @_upblock_kernel(%arg0: i32, %arg1: memref<8x64xf32, #tpu.memory_space<vmem>>, %arg2: memref<1x48xf32, #tpu.memory_space<vmem>>, %arg3: memref<1x48xf32, #tpu.memory_space<vmem>>, %arg4: memref<56x32xbf16, #tpu.memory_space<vmem>>, %arg5: memref<1x32xf32, #tpu.memory_space<vmem>>, %arg6: memref<1x32xf32, #tpu.memory_space<vmem>>, %arg7: memref<1x32xf32, #tpu.memory_space<vmem>>, %arg8: memref<40x32xbf16, #tpu.memory_space<vmem>>, %arg9: memref<1x32xf32, #tpu.memory_space<vmem>>, %arg10: memref<1x32xf32, #tpu.memory_space<vmem>>, %arg11: memref<1x32xf32, #tpu.memory_space<vmem>>, %arg12: memref<80x32xbf16, #tpu.memory_space<vmem>>, %arg13: memref<1x32xf32, #tpu.memory_space<vmem>>, %arg14: memref<32x32xbf16, #tpu.memory_space<vmem>>, %arg15: memref<1x32xf32, #tpu.memory_space<vmem>>, %arg16: memref<32x32xbf16, #tpu.memory_space<vmem>>, %arg17: memref<1x32xf32, #tpu.memory_space<vmem>>, %arg18: memref<8x32xf32, #tpu.memory_space<vmem>>) attributes {dimension_semantics = [#tpu.dimension_semantics<parallel>], iteration_bounds = array<i64: 1>, scalar_prefetch = 0 : i64, scratch_operands = 0 : i64, tpu.core_type = #tpu.core_type<tc>, window_params = [{transform_indices = @transform_0, window_bounds = array<i64: 8, 64>}, {pipeline_mode = #tpu.pipeline_mode<synchronous>, transform_indices = @transform_1, window_bounds = array<i64: 1, 48>}, {pipeline_mode = #tpu.pipeline_mode<synchronous>, transform_indices = @transform_2, window_bounds = array<i64: 1, 48>}, {pipeline_mode = #tpu.pipeline_mode<synchronous>, transform_indices = @transform_3, window_bounds = array<i64: 56, 32>}, {pipeline_mode = #tpu.pipeline_mode<synchronous>, transform_indices = @transform_4, window_bounds = array<i64: 1, 32>}, {pipeline_mode = #tpu.pipeline_mode<synchronous>, transform_indices = @transform_5, window_bounds = array<i64: 1, 32>}, {pipeline_mode = #tpu.pipeline_mode<synchronous>, transform_indices = @transform_6, window_bounds = array<i64: 1, 32>}, {pipeline_mode = #tpu.pipeline_mode<synchronous>, transform_indices = @transform_7, window_bounds = array<i64: 40, 32>}, {pipeline_mode = #tpu.pipeline_mode<synchronous>, transform_indices = @transform_8, window_bounds = array<i64: 1, 32>}, {pipeline_mode = #tpu.pipeline_mode<synchronous>, transform_indices = @transform_9, window_bounds = array<i64: 1, 32>}, {pipeline_mode = #tpu.pipeline_mode<synchronous>, transform_indices = @transform_10, window_bounds = array<i64: 1, 32>}, {pipeline_mode = #tpu.pipeline_mode<synchronous>, transform_indices = @transform_11, window_bounds = array<i64: 80, 32>}, {pipeline_mode = #tpu.pipeline_mode<synchronous>, transform_indices = @transform_12, window_bounds = array<i64: 1, 32>}, {pipeline_mode = #tpu.pipeline_mode<synchronous>, transform_indices = @transform_13, window_bounds = array<i64: 32, 32>}, {pipeline_mode = #tpu.pipeline_mode<synchronous>, transform_indices = @transform_14, window_bounds = array<i64: 1, 32>}, {pipeline_mode = #tpu.pipeline_mode<synchronous>, transform_indices = @transform_15, window_bounds = array<i64: 32, 32>}, {pipeline_mode = #tpu.pipeline_mode<synchronous>, transform_indices = @transform_16, window_bounds = array<i64: 1, 32>}, {transform_indices = @transform_17, window_bounds = array<i64: 8, 32>}]} {
    %c0 = arith.constant 0 : index
    %c0_0 = arith.constant 0 : index
    %0 = vector.load %arg1[%c0, %c0_0] : memref<8x64xf32, #tpu.memory_space<vmem>>, vector<8x64xf32>
    %1 = vector.extract_strided_slice %0 {offsets = [0, 0], sizes = [8, 48], strides = [1, 1]} : vector<8x64xf32> to vector<8x48xf32>
    %2 = vector.extract_strided_slice %0 {offsets = [0, 48], sizes = [8, 8], strides = [1, 1]} : vector<8x64xf32> to vector<8x8xf32>
    %3 = vector.extract_strided_slice %0 {offsets = [0, 56], sizes = [8, 8], strides = [1, 1]} : vector<8x64xf32> to vector<8x8xf32>
    %c0_1 = arith.constant 0 : index
    %c0_2 = arith.constant 0 : index
    %4 = vector.load %arg2[%c0_1, %c0_2] : memref<1x48xf32, #tpu.memory_space<vmem>>, vector<1x48xf32>
    %c0_3 = arith.constant 0 : index
    %c0_4 = arith.constant 0 : index
    %5 = vector.load %arg3[%c0_3, %c0_4] : memref<1x48xf32, #tpu.memory_space<vmem>>, vector<1x48xf32>
    %cst = arith.constant dense<0.000000e+00> : vector<8xf32>
    %6 = vector.multi_reduction <add>, %1, %cst [1] : vector<8x48xf32> to vector<8xf32>
    %7 = vector.shape_cast %6 : vector<8xf32> to vector<8x1xf32>
    %cst_5 = arith.constant 4.800000e+01 : f32
    %8 = vector.broadcast %cst_5 : f32 to vector<8x1xf32>
    %9 = arith.divf %7, %8 : vector<8x1xf32>
    %10 = vector.broadcast %9 : vector<8x1xf32> to vector<8x48xf32>
    %11 = arith.subf %1, %10 : vector<8x48xf32>
    %12 = arith.mulf %11, %11 : vector<8x48xf32>
    %cst_6 = arith.constant dense<0.000000e+00> : vector<8xf32>
    %13 = vector.multi_reduction <add>, %12, %cst_6 [1] : vector<8x48xf32> to vector<8xf32>
    %14 = vector.shape_cast %13 : vector<8xf32> to vector<8x1xf32>
    %cst_7 = arith.constant 4.800000e+01 : f32
    %15 = vector.broadcast %cst_7 : f32 to vector<8x1xf32>
    %16 = arith.divf %14, %15 : vector<8x1xf32>
    %17 = vector.broadcast %9 : vector<8x1xf32> to vector<8x48xf32>
    %18 = arith.subf %1, %17 : vector<8x48xf32>
    %cst_8 = arith.constant 9.99999974E-6 : f32
    %19 = vector.broadcast %cst_8 : f32 to vector<8x1xf32>
    %20 = arith.addf %16, %19 : vector<8x1xf32>
    %21 = math.rsqrt %20 : vector<8x1xf32>
    %22 = vector.broadcast %21 : vector<8x1xf32> to vector<8x48xf32>
    %23 = arith.mulf %18, %22 : vector<8x48xf32>
    %24 = vector.broadcast %4 : vector<1x48xf32> to vector<8x48xf32>
    %25 = arith.mulf %23, %24 : vector<8x48xf32>
    %26 = vector.broadcast %5 : vector<1x48xf32> to vector<8x48xf32>
    %27 = arith.addf %25, %26 : vector<8x48xf32>
    %28 = arith.negf %27 : vector<8x48xf32>
    %29 = math.exp %28 : vector<8x48xf32>
    %cst_9 = arith.constant 1.000000e+00 : f32
    %30 = vector.broadcast %cst_9 : f32 to vector<8x48xf32>
    %31 = arith.addf %30, %29 : vector<8x48xf32>
    %32 = arith.divf %30, %31 : vector<8x48xf32>
    %33 = arith.mulf %27, %32 : vector<8x48xf32>
    %34 = arith.negf %2 : vector<8x8xf32>
    %35 = math.exp %34 : vector<8x8xf32>
    %cst_10 = arith.constant 1.000000e+00 : f32
    %36 = vector.broadcast %cst_10 : f32 to vector<8x8xf32>
    %37 = arith.addf %36, %35 : vector<8x8xf32>
    %38 = arith.divf %36, %37 : vector<8x8xf32>
    %39 = arith.mulf %2, %38 : vector<8x8xf32>
    %40 = tpu.concatenate %33, %39 in 1 : vector<8x48xf32>, vector<8x8xf32> -> vector<8x56xf32>
    %41 = arith.truncf %40 : vector<8x56xf32> to vector<8x56xbf16>
    %c0_11 = arith.constant 0 : index
    %c0_12 = arith.constant 0 : index
    %42 = vector.load %arg4[%c0_11, %c0_12] : memref<56x32xbf16, #tpu.memory_space<vmem>>, vector<56x32xbf16>
    %cst_13 = arith.constant dense<0.000000e+00> : vector<8x32xf32>
    %43 = tpu.matmul %41, %42, %cst_13 {dimension_numbers = #tpu.dot_dimension_numbers<[1], [0], [0], [1], [0, 0, 1, 1], [], []>} : vector<8x56xbf16>, vector<56x32xbf16>, vector<8x32xf32> -> vector<8x32xf32>
    %c0_14 = arith.constant 0 : index
    %c0_15 = arith.constant 0 : index
    %44 = vector.load %arg5[%c0_14, %c0_15] : memref<1x32xf32, #tpu.memory_space<vmem>>, vector<1x32xf32>
    %45 = vector.broadcast %44 : vector<1x32xf32> to vector<8x32xf32>
    %46 = arith.addf %43, %45 : vector<8x32xf32>
    %c0_16 = arith.constant 0 : index
    %c0_17 = arith.constant 0 : index
    %47 = vector.load %arg6[%c0_16, %c0_17] : memref<1x32xf32, #tpu.memory_space<vmem>>, vector<1x32xf32>
    %c0_18 = arith.constant 0 : index
    %c0_19 = arith.constant 0 : index
    %48 = vector.load %arg7[%c0_18, %c0_19] : memref<1x32xf32, #tpu.memory_space<vmem>>, vector<1x32xf32>
    %cst_20 = arith.constant dense<0.000000e+00> : vector<8xf32>
    %49 = vector.multi_reduction <add>, %46, %cst_20 [1] : vector<8x32xf32> to vector<8xf32>
    %50 = vector.shape_cast %49 : vector<8xf32> to vector<8x1xf32>
    %cst_21 = arith.constant 3.200000e+01 : f32
    %51 = vector.broadcast %cst_21 : f32 to vector<8x1xf32>
    %52 = arith.divf %50, %51 : vector<8x1xf32>
    %53 = vector.broadcast %52 : vector<8x1xf32> to vector<8x32xf32>
    %54 = arith.subf %46, %53 : vector<8x32xf32>
    %55 = arith.mulf %54, %54 : vector<8x32xf32>
    %cst_22 = arith.constant dense<0.000000e+00> : vector<8xf32>
    %56 = vector.multi_reduction <add>, %55, %cst_22 [1] : vector<8x32xf32> to vector<8xf32>
    %57 = vector.shape_cast %56 : vector<8xf32> to vector<8x1xf32>
    %cst_23 = arith.constant 3.200000e+01 : f32
    %58 = vector.broadcast %cst_23 : f32 to vector<8x1xf32>
    %59 = arith.divf %57, %58 : vector<8x1xf32>
    %60 = vector.broadcast %52 : vector<8x1xf32> to vector<8x32xf32>
    %61 = arith.subf %46, %60 : vector<8x32xf32>
    %cst_24 = arith.constant 9.99999974E-6 : f32
    %62 = vector.broadcast %cst_24 : f32 to vector<8x1xf32>
    %63 = arith.addf %59, %62 : vector<8x1xf32>
    %64 = math.rsqrt %63 : vector<8x1xf32>
    %65 = vector.broadcast %64 : vector<8x1xf32> to vector<8x32xf32>
    %66 = arith.mulf %61, %65 : vector<8x32xf32>
    %67 = vector.broadcast %47 : vector<1x32xf32> to vector<8x32xf32>
    %68 = arith.mulf %66, %67 : vector<8x32xf32>
    %69 = vector.broadcast %48 : vector<1x32xf32> to vector<8x32xf32>
    %70 = arith.addf %68, %69 : vector<8x32xf32>
    %71 = arith.negf %70 : vector<8x32xf32>
    %72 = math.exp %71 : vector<8x32xf32>
    %cst_25 = arith.constant 1.000000e+00 : f32
    %73 = vector.broadcast %cst_25 : f32 to vector<8x32xf32>
    %74 = arith.addf %73, %72 : vector<8x32xf32>
    %75 = arith.divf %73, %74 : vector<8x32xf32>
    %76 = arith.mulf %70, %75 : vector<8x32xf32>
    %77 = arith.negf %3 : vector<8x8xf32>
    %78 = math.exp %77 : vector<8x8xf32>
    %cst_26 = arith.constant 1.000000e+00 : f32
    %79 = vector.broadcast %cst_26 : f32 to vector<8x8xf32>
    %80 = arith.addf %79, %78 : vector<8x8xf32>
    %81 = arith.divf %79, %80 : vector<8x8xf32>
    %82 = arith.mulf %3, %81 : vector<8x8xf32>
    %83 = tpu.concatenate %76, %82 in 1 : vector<8x32xf32>, vector<8x8xf32> -> vector<8x40xf32>
    %84 = arith.truncf %83 : vector<8x40xf32> to vector<8x40xbf16>
    %c0_27 = arith.constant 0 : index
    %c0_28 = arith.constant 0 : index
    %85 = vector.load %arg8[%c0_27, %c0_28] : memref<40x32xbf16, #tpu.memory_space<vmem>>, vector<40x32xbf16>
    %cst_29 = arith.constant dense<0.000000e+00> : vector<8x32xf32>
    %86 = tpu.matmul %84, %85, %cst_29 {dimension_numbers = #tpu.dot_dimension_numbers<[1], [0], [0], [1], [0, 0, 1, 1], [], []>} : vector<8x40xbf16>, vector<40x32xbf16>, vector<8x32xf32> -> vector<8x32xf32>
    %c0_30 = arith.constant 0 : index
    %c0_31 = arith.constant 0 : index
    %87 = vector.load %arg9[%c0_30, %c0_31] : memref<1x32xf32, #tpu.memory_space<vmem>>, vector<1x32xf32>
    %88 = vector.broadcast %87 : vector<1x32xf32> to vector<8x32xf32>
    %89 = arith.addf %86, %88 : vector<8x32xf32>
    %c0_32 = arith.constant 0 : index
    %c0_33 = arith.constant 0 : index
    %90 = vector.load %arg10[%c0_32, %c0_33] : memref<1x32xf32, #tpu.memory_space<vmem>>, vector<1x32xf32>
    %c0_34 = arith.constant 0 : index
    %c0_35 = arith.constant 0 : index
    %91 = vector.load %arg11[%c0_34, %c0_35] : memref<1x32xf32, #tpu.memory_space<vmem>>, vector<1x32xf32>
    %cst_36 = arith.constant dense<0.000000e+00> : vector<8xf32>
    %92 = vector.multi_reduction <add>, %89, %cst_36 [1] : vector<8x32xf32> to vector<8xf32>
    %93 = vector.shape_cast %92 : vector<8xf32> to vector<8x1xf32>
    %cst_37 = arith.constant 3.200000e+01 : f32
    %94 = vector.broadcast %cst_37 : f32 to vector<8x1xf32>
    %95 = arith.divf %93, %94 : vector<8x1xf32>
    %96 = vector.broadcast %95 : vector<8x1xf32> to vector<8x32xf32>
    %97 = arith.subf %89, %96 : vector<8x32xf32>
    %98 = arith.mulf %97, %97 : vector<8x32xf32>
    %cst_38 = arith.constant dense<0.000000e+00> : vector<8xf32>
    %99 = vector.multi_reduction <add>, %98, %cst_38 [1] : vector<8x32xf32> to vector<8xf32>
    %100 = vector.shape_cast %99 : vector<8xf32> to vector<8x1xf32>
    %cst_39 = arith.constant 3.200000e+01 : f32
    %101 = vector.broadcast %cst_39 : f32 to vector<8x1xf32>
    %102 = arith.divf %100, %101 : vector<8x1xf32>
    %103 = vector.broadcast %95 : vector<8x1xf32> to vector<8x32xf32>
    %104 = arith.subf %89, %103 : vector<8x32xf32>
    %cst_40 = arith.constant 9.99999974E-6 : f32
    %105 = vector.broadcast %cst_40 : f32 to vector<8x1xf32>
    %106 = arith.addf %102, %105 : vector<8x1xf32>
    %107 = math.rsqrt %106 : vector<8x1xf32>
    %108 = vector.broadcast %107 : vector<8x1xf32> to vector<8x32xf32>
    %109 = arith.mulf %104, %108 : vector<8x32xf32>
    %110 = vector.broadcast %90 : vector<1x32xf32> to vector<8x32xf32>
    %111 = arith.mulf %109, %110 : vector<8x32xf32>
    %112 = vector.broadcast %91 : vector<1x32xf32> to vector<8x32xf32>
    %113 = arith.addf %111, %112 : vector<8x32xf32>
    %114 = arith.negf %113 : vector<8x32xf32>
    %115 = math.exp %114 : vector<8x32xf32>
    %cst_41 = arith.constant 1.000000e+00 : f32
    %116 = vector.broadcast %cst_41 : f32 to vector<8x32xf32>
    %117 = arith.addf %116, %115 : vector<8x32xf32>
    %118 = arith.divf %116, %117 : vector<8x32xf32>
    %119 = arith.mulf %113, %118 : vector<8x32xf32>
    %120 = tpu.concatenate %119, %1 in 1 : vector<8x32xf32>, vector<8x48xf32> -> vector<8x80xf32>
    %121 = arith.truncf %120 : vector<8x80xf32> to vector<8x80xbf16>
    %c0_42 = arith.constant 0 : index
    %c0_43 = arith.constant 0 : index
    %122 = vector.load %arg12[%c0_42, %c0_43] : memref<80x32xbf16, #tpu.memory_space<vmem>>, vector<80x32xbf16>
    %cst_44 = arith.constant dense<0.000000e+00> : vector<8x32xf32>
    %123 = tpu.matmul %121, %122, %cst_44 {dimension_numbers = #tpu.dot_dimension_numbers<[1], [0], [0], [1], [0, 0, 1, 1], [], []>} : vector<8x80xbf16>, vector<80x32xbf16>, vector<8x32xf32> -> vector<8x32xf32>
    %c0_45 = arith.constant 0 : index
    %c0_46 = arith.constant 0 : index
    %124 = vector.load %arg13[%c0_45, %c0_46] : memref<1x32xf32, #tpu.memory_space<vmem>>, vector<1x32xf32>
    %125 = vector.broadcast %124 : vector<1x32xf32> to vector<8x32xf32>
    %126 = arith.addf %123, %125 : vector<8x32xf32>
    %127 = arith.truncf %126 : vector<8x32xf32> to vector<8x32xbf16>
    %c0_47 = arith.constant 0 : index
    %c0_48 = arith.constant 0 : index
    %128 = vector.load %arg14[%c0_47, %c0_48] : memref<32x32xbf16, #tpu.memory_space<vmem>>, vector<32x32xbf16>
    %cst_49 = arith.constant dense<0.000000e+00> : vector<8x32xf32>
    %129 = tpu.matmul %127, %128, %cst_49 {dimension_numbers = #tpu.dot_dimension_numbers<[1], [0], [0], [1], [0, 0, 1, 1], [], []>} : vector<8x32xbf16>, vector<32x32xbf16>, vector<8x32xf32> -> vector<8x32xf32>
    %c0_50 = arith.constant 0 : index
    %c0_51 = arith.constant 0 : index
    %130 = vector.load %arg15[%c0_50, %c0_51] : memref<1x32xf32, #tpu.memory_space<vmem>>, vector<1x32xf32>
    %131 = vector.broadcast %130 : vector<1x32xf32> to vector<8x32xf32>
    %132 = arith.addf %129, %131 : vector<8x32xf32>
    %133 = arith.truncf %132 : vector<8x32xf32> to vector<8x32xbf16>
    %c0_52 = arith.constant 0 : index
    %c0_53 = arith.constant 0 : index
    %134 = vector.load %arg16[%c0_52, %c0_53] : memref<32x32xbf16, #tpu.memory_space<vmem>>, vector<32x32xbf16>
    %cst_54 = arith.constant dense<0.000000e+00> : vector<8x32xf32>
    %135 = tpu.matmul %133, %134, %cst_54 {dimension_numbers = #tpu.dot_dimension_numbers<[1], [0], [0], [1], [0, 0, 1, 1], [], []>} : vector<8x32xbf16>, vector<32x32xbf16>, vector<8x32xf32> -> vector<8x32xf32>
    %c0_55 = arith.constant 0 : index
    %c0_56 = arith.constant 0 : index
    %136 = vector.load %arg17[%c0_55, %c0_56] : memref<1x32xf32, #tpu.memory_space<vmem>>, vector<1x32xf32>
    %137 = vector.broadcast %136 : vector<1x32xf32> to vector<8x32xf32>
    %138 = arith.addf %135, %137 : vector<8x32xf32>
    %139 = arith.addf %138, %126 : vector<8x32xf32>
    %c0_57 = arith.constant 0 : index
    %c0_58 = arith.constant 0 : index
    %140 = vector.load %arg18[%c0_57, %c0_58] : memref<8x32xf32, #tpu.memory_space<vmem>>, vector<8x32xf32>
    tpu.vector_store %arg18[%c0_57, %c0_58], %139 {strides = array<i32>} : memref<8x32xf32, #tpu.memory_space<vmem>>, vector<8x32xf32>,
    return
  }
  func.func @transform_0(%arg0: i32) -> (i32, i32) {
    %c0_i32 = arith.constant 0 : i32
    %c0_i32_0 = arith.constant 0 : i32
    return %arg0, %c0_i32 : i32, i32
  }
  func.func @transform_1(%arg0: i32) -> (i32, i32) {
    %c0_i32 = arith.constant 0 : i32
    %c0_i32_0 = arith.constant 0 : i32
    %c0_i32_1 = arith.constant 0 : i32
    return %c0_i32, %c0_i32_0 : i32, i32
  }
  func.func @transform_2(%arg0: i32) -> (i32, i32) {
    %c0_i32 = arith.constant 0 : i32
    %c0_i32_0 = arith.constant 0 : i32
    %c0_i32_1 = arith.constant 0 : i32
    return %c0_i32, %c0_i32_0 : i32, i32
  }
  func.func @transform_3(%arg0: i32) -> (i32, i32) {
    %c0_i32 = arith.constant 0 : i32
    %c0_i32_0 = arith.constant 0 : i32
    %c0_i32_1 = arith.constant 0 : i32
    return %c0_i32, %c0_i32_0 : i32, i32
  }
  func.func @transform_4(%arg0: i32) -> (i32, i32) {
    %c0_i32 = arith.constant 0 : i32
    %c0_i32_0 = arith.constant 0 : i32
    %c0_i32_1 = arith.constant 0 : i32
    return %c0_i32, %c0_i32_0 : i32, i32
  }
  func.func @transform_5(%arg0: i32) -> (i32, i32) {
    %c0_i32 = arith.constant 0 : i32
    %c0_i32_0 = arith.constant 0 : i32
    %c0_i32_1 = arith.constant 0 : i32
    return %c0_i32, %c0_i32_0 : i32, i32
  }
  func.func @transform_6(%arg0: i32) -> (i32, i32) {
    %c0_i32 = arith.constant 0 : i32
    %c0_i32_0 = arith.constant 0 : i32
    %c0_i32_1 = arith.constant 0 : i32
    return %c0_i32, %c0_i32_0 : i32, i32
  }
  func.func @transform_7(%arg0: i32) -> (i32, i32) {
    %c0_i32 = arith.constant 0 : i32
    %c0_i32_0 = arith.constant 0 : i32
    %c0_i32_1 = arith.constant 0 : i32
    return %c0_i32, %c0_i32_0 : i32, i32
  }
  func.func @transform_8(%arg0: i32) -> (i32, i32) {
    %c0_i32 = arith.constant 0 : i32
    %c0_i32_0 = arith.constant 0 : i32
    %c0_i32_1 = arith.constant 0 : i32
    return %c0_i32, %c0_i32_0 : i32, i32
  }
  func.func @transform_9(%arg0: i32) -> (i32, i32) {
    %c0_i32 = arith.constant 0 : i32
    %c0_i32_0 = arith.constant 0 : i32
    %c0_i32_1 = arith.constant 0 : i32
    return %c0_i32, %c0_i32_0 : i32, i32
  }
  func.func @transform_10(%arg0: i32) -> (i32, i32) {
    %c0_i32 = arith.constant 0 : i32
    %c0_i32_0 = arith.constant 0 : i32
    %c0_i32_1 = arith.constant 0 : i32
    return %c0_i32, %c0_i32_0 : i32, i32
  }
  func.func @transform_11(%arg0: i32) -> (i32, i32) {
    %c0_i32 = arith.constant 0 : i32
    %c0_i32_0 = arith.constant 0 : i32
    %c0_i32_1 = arith.constant 0 : i32
    return %c0_i32, %c0_i32_0 : i32, i32
  }
  func.func @transform_12(%arg0: i32) -> (i32, i32) {
    %c0_i32 = arith.constant 0 : i32
    %c0_i32_0 = arith.constant 0 : i32
    %c0_i32_1 = arith.constant 0 : i32
    return %c0_i32, %c0_i32_0 : i32, i32
  }
  func.func @transform_13(%arg0: i32) -> (i32, i32) {
    %c0_i32 = arith.constant 0 : i32
    %c0_i32_0 = arith.constant 0 : i32
    %c0_i32_1 = arith.constant 0 : i32
    return %c0_i32, %c0_i32_0 : i32, i32
  }
  func.func @transform_14(%arg0: i32) -> (i32, i32) {
    %c0_i32 = arith.constant 0 : i32
    %c0_i32_0 = arith.constant 0 : i32
    %c0_i32_1 = arith.constant 0 : i32
    return %c0_i32, %c0_i32_0 : i32, i32
  }
  func.func @transform_15(%arg0: i32) -> (i32, i32) {
    %c0_i32 = arith.constant 0 : i32
    %c0_i32_0 = arith.constant 0 : i32
    %c0_i32_1 = arith.constant 0 : i32
    return %c0_i32, %c0_i32_0 : i32, i32
  }
  func.func @transform_16(%arg0: i32) -> (i32, i32) {
    %c0_i32 = arith.constant 0 : i32
    %c0_i32_0 = arith.constant 0 : i32
    %c0_i32_1 = arith.constant 0 : i32
    return %c0_i32, %c0_i32_0 : i32, i32
  }
  func.func @transform_17(%arg0: i32) -> (i32, i32) {
    %c0_i32 = arith.constant 0 : i32
    %c0_i32_0 = arith.constant 0 : i32
    return %arg0, %c0_i32 : i32, i32
  }
}

</mosaic_0001>

<bundles_post_ra>
// kernel: tpu_custom_call.1
= control target key start
LH: loop header
LB: loop body
LE: loop exit
PB: predicated region body
PF: predicated region fallthrough
CT: control target
= control target key end

     0   :  { %s871_s0 = inlined_call_operand.vmem [shape: f32[8,64], index: 0, kind: input, shape index: {}]   ;;  %s872_s1 = inlined_call_operand.vmem [shape: f32[1,48], index: 1, kind: input, shape index: {}]   ;;  %s873_s2 = inlined_call_operand.vmem [shape: f32[1,48], index: 2, kind: input, shape index: {}]   ;;  %s874_s3 = inlined_call_operand.vmem [shape: bf16[56,32], index: 3, kind: input, shape index: {}]   ;;  %s875_s4 = inlined_call_operand.vmem [shape: f32[1,32], index: 4, kind: input, shape index: {}]   ;;  %s876_s5 = inlined_call_operand.vmem [shape: f32[1,32], index: 5, kind: input, shape index: {}]   ;;  %s877_s6 = inlined_call_operand.vmem [shape: f32[1,32], index: 6, kind: input, shape index: {}]   ;;  %s878_s7 = inlined_call_operand.vmem [shape: bf16[40,32], index: 7, kind: input, shape index: {}]   ;;  %s879_s8 = inlined_call_operand.vmem [shape: f32[1,32], index: 8, kind: input, shape index: {}]   ;;  %s880_s9 = inlined_call_operand.vmem [shape: f32[1,32], index: 9, kind: input, shape index: {}]   ;;  %s881_s10 = inlined_call_operand.vmem [shape: f32[1,32], index: 10, kind: input, shape index: {}]   ;;  %s882_s11 = inlined_call_operand.vmem [shape: bf16[80,32], index: 11, kind: input, shape index: {}]   ;;  %s883_s12 = inlined_call_operand.vmem [shape: f32[1,32], index: 12, kind: input, shape index: {}]   ;;  %s884_s13 = inlined_call_operand.vmem [shape: bf16[32,32], index: 13, kind: input, shape index: {}]   ;;  %s885_s14 = inlined_call_operand.vmem [shape: f32[1,32], index: 14, kind: input, shape index: {}]   ;;  %s886_s15 = inlined_call_operand.vmem [shape: bf16[32,32], index: 15, kind: input, shape index: {}]   ;;  %s887_s16 = inlined_call_operand.vmem [shape: f32[1,32], index: 16, kind: input, shape index: {}]   ;;  %s888_s17 = inlined_call_operand.hbm [shape: f32[8,32], index: 17, kind: output, shape index: {}]  }
   0x1   :  { %889 = sst [smem:[#allocation5_spill]] %s871_s0 }
   0x2   :  { %890 = sst [smem:[#allocation6_spill]] %s872_s1 }
   0x3   :  { %s891_s26 = sld [smem:[#allocation5_spill]]  ;;  %vm61_vm0 = vcmask 392192  }
   0x9   :  { %v760_v0 = vld [vmem:[%s891_s26] sm:$0xff] }
   0xa   :  { %v62_v1 = vsel %vm61_vm0, %v760_v0, 0.0 }
   0xb   :  { %63 = vadd.xlane.f32.xlu0 %v62_v1 }
   0xc   :  { %22 = vsyncpa [#allocation3], 0  ;;  %v662_v2 = vmov 48.0   ;;  %v147_v14 = vld [vmem:[%s874_s3 + $0x18] sm:$0xf]  ;;  %vm177_vm2 = vcmask 1043456  }
   0xd   :  { %610 = vrcp.f32 %v662_v2  ;;  %v165_v15 = vunpack.c.l.b16 %v147_v14  ;;  %v582_v18 = vld [vmem:[%s874_s3 + $0x10] sm:$0xff]  ;;  %v581_v22 = vld [vmem:[%s874_s3 + $0x8] sm:$0xff]  ;;  %v516_v23 = vmul.f32 -1.442695, %v760_v0  ;;  %v580_v24 = vld [vmem:[%s874_s3] sm:$0xff]  ;;  %s892_s22 = sld [smem:[#allocation6_spill]] }
   0xe   :  { %v600_v36 = vld [vmem:[%s873_s2] ss:$0 sm:$0xff]  ;;  %vm173_vm14 = vcmask 457728   ;;  %vm196_vm15 = vcmask 261120   ;;  %s663_s25 = smov 104   ;;  %s506_s3 = sshll.u32 %s888_s17, 4  ;;  %s507_s3 = int_to_ptr.hbm [resolvable:$true] %s506_s3 }
   0xf   :  { %v169_v16 = vpack.c.b16 %v165_v15, %v165_v15 }
  0x11   :  { %v179_v17 = vsel %vm177_vm2, %v169_v16, 0 }
  0x12   :  { %185 = vmatpush.bf16.msra.mxu0 %v179_v17 }
  0x13   :  { %v611_v3 = vpop.eup %610  ;;  %v599_v33 = vld [vmem:[%s892_s22] ss:$0 sm:$0xff] }
  0x14   :  { %v66_v4 = vmul.f32 48.0, %v611_v3  ;;  %vm70_vm1 = vweird.f32 %v611_v3 }
  0x16   :  { %v67_v5 = vsub.f32 1.0, %v66_v4  ;;  %186 = vmatpush.bf16.msra.mxu0 %v582_v18 }
  0x18   :  { %v68_v6 = vmul.f32 %v611_v3, %v67_v5 }
  0x1a   :  { %v69_v7 = vadd.f32 %v611_v3, %v68_v6  ;;  %187 = vmatpush.bf16.msra.mxu0 %v581_v22 }
  0x1c   :  { %v71_v8 = vsel %vm70_vm1, %v611_v3, %v69_v7  ;;  %v601_v3 = vld [vmem:[%s875_s4] ss:$0 sm:$0xff] }
  0x1e   :  { %188 = vmatpush.bf16.msra.mxu0 %v580_v24  ;;  %v584_v24 = vld [vmem:[%s878_s7 + $0x8] sm:$0xff] }
  0x7e   :  { %v64_v9 = vpop.xlane.xlu0 %63 }
  0x7f   :  { %v72_v10 = vmul.f32 %v71_v8, %v64_v9 }
  0x81   :  { %v73_v11 = vsub.f32 %v760_v0, %v72_v10 }
  0x83   :  { %v74_v12 = vmul.f32 %v73_v11, %v73_v11 }
  0x85   :  { %v75_v13 = vsel %vm61_vm0, %v74_v12, 0.0 }
  0x86   :  { %76 = vadd.xlane.f32.xlu0 %v75_v13 }
  0xf9   :  { %v77_v19 = vpop.xlane.xlu0 %76 }
  0xfa   :  { %v78_v20 = vmul.f32 %v77_v19, %v71_v8  ;;  %v664_v8 = vmov 32.0  }
  0xfc   :  { %v79_v21 = vadd.f32 1e-05, %v78_v20  ;;  %v264_v20 = vld [vmem:[%s878_s7 + $0x10] sm:$0xf] }
  0xfe   :  { %612 = vrsqrt.f32 %v79_v21  ;;  %vm86_vm4 = vweird.f32 %v79_v21 }
  0xff   :  { %614 = vpow2.f32 %v516_v23 }
 0x104   :  { %v613_v25 = vpop.eup %612 }
 0x105   :  { %v81_v26 = vmul.f32 %v613_v25, %v79_v21  ;;  %v615_v29 = vpop.eup %614  ;;  %vm87_vm3 = vweird.f32 %v613_v25  ;;  %v278_v21 = vunpack.c.l.b16 %v264_v20  ;;  %v606_v20 = vld [vmem:[%s881_s10] ss:$0 sm:$0xff] }
 0x106   :  { %v122_v31 = vadd.f32 1.0, %v615_v29  ;;  %vm88_vm5 = vmor %vm86_vm4, %vm87_vm3 }
 0x107   :  { %v82_v27 = vmul.f32 %v613_v25, %v81_v26  ;;  %v281_v22 = vpack.c.b16 %v278_v21, %v278_v21 }
 0x108   :  { %616 = vrcp.f32 %v122_v31  ;;  %vm128_vm6 = vweird.f32 %v122_v31  ;;  %v134_v46 = vand.u32 2147483648, %v122_v31  ;;  %v132_v48 = vand.u32 2147483647, %v122_v31 }
 0x109   :  { %v83_v28 = vmul.f32 0.5, %v82_v27  ;;  %v289_v23 = vsel %vm177_vm2, %v281_v22, 0  ;;  %v585_v22 = vld [vmem:[%s882_s11] sm:$0xff] }
 0x10a   :  { %v135_v51 = vor.u32 1.1754944e-38, %v134_v46  ;;  %vm133_vm9 = vcmp.eq.f32.partialorder %v132_v48, 8.507059e+37  ;;  %296 = vmatpush.bf16.msra.mxu1 %v289_v23 }
 0x10b   :  { %v84_v30 = vsub.f32 1.5, %v83_v28 }
 0x10d   :  { %v85_v32 = vmul.f32 %v613_v25, %v84_v30 }
 0x10e   :  { %v617_v40 = vpop.eup %616  ;;  %297 = vmatpush.bf16.msra.mxu1 %v584_v24 }
 0x10f   :  { %v89_v34 = vsel %vm88_vm5, %v613_v25, %v85_v32  ;;  %v124_v41 = vmul.f32 %v617_v40, %v122_v31  ;;  %vm129_vm7 = vweird.f32 %v617_v40 }
 0x110   :  { %v90_v35 = vmul.f32 %v89_v34, %v73_v11  ;;  %vm130_vm8 = vmor %vm128_vm6, %vm129_vm7  ;;  %v602_v34 = vld [vmem:[%s876_s5] ss:$0 sm:$0xff] }
 0x111   :  { %v125_v43 = vsub.f32 1.0, %v124_v41 }
 0x112   :  { %v94_v37 = vmul.f32 %v599_v33, %v90_v35 }
 0x113   :  { %v126_v45 = vmul.f32 %v617_v40, %v125_v43 }
 0x114   :  { %v98_v38 = vadd.f32 %v600_v36, %v94_v37  ;;  %v603_v37 = vld [vmem:[%s877_s6] ss:$0 sm:$0xff] }
 0x115   :  { %v127_v47 = vadd.f32 %v617_v40, %v126_v45 }
 0x116   :  { %v515_v39 = vmul.f32 -1.442695, %v98_v38 }
 0x117   :  { %v131_v53 = vsel %vm130_vm8, %v617_v40, %v127_v47  ;;  %vm284_vm8 = vcmask 326656  }
 0x118   :  { %618 = vpow2.f32 %v515_v39  ;;  %v136_v57 = vsel %vm133_vm9, %v135_v51, %v131_v53  ;;  %v583_v39 = vld [vmem:[%s878_s7] sm:$0xff]  ;;  %s665_s7 = smov 32  }
 0x119   :  { %v138_v61 = vmul.f32 %v136_v57, %v760_v0  ;;  %298 = vmatpush.bf16.msra.mxu1 %v583_v39 }
 0x11b   :  { %255 = vrot.lane.b32.xlu2 %v138_v61, %s663_s25 }
 0x11e   :  { %v619_v42 = vpop.eup %618 }
 0x11f   :  { %v102_v44 = vadd.f32 1.0, %v619_v42 }
 0x121   :  { %620 = vrcp.f32 %v102_v44  ;;  %v114_v54 = vand.u32 2147483648, %v102_v44  ;;  %v112_v56 = vand.u32 2147483647, %v102_v44  ;;  %vm108_vm11 = vweird.f32 %v102_v44 }
 0x122   :  { %622 = vrcp.f32 %v664_v8 }
 0x123   :  { %v115_v59 = vor.u32 1.1754944e-38, %v114_v54  ;;  %vm113_vm13 = vcmp.eq.f32.partialorder %v112_v56, 8.507059e+37 }
 0x127   :  { %v621_v49 = vpop.eup %620 }
 0x128   :  { %v104_v50 = vmul.f32 %v621_v49, %v102_v44  ;;  %vm109_vm10 = vweird.f32 %v621_v49  ;;  %v623_v9 = vpop.eup %622 }
 0x129   :  { %vm110_vm12 = vmor %vm108_vm11, %vm109_vm10  ;;  %v201_v10 = vmul.f32 32.0, %v623_v9 }
 0x12a   :  { %v105_v52 = vsub.f32 1.0, %v104_v50 }
 0x12b   :  { %v202_v11 = vsub.f32 1.0, %v201_v10 }
 0x12c   :  { %v106_v55 = vmul.f32 %v621_v49, %v105_v52 }
 0x12d   :  { %v203_v12 = vmul.f32 %v623_v9, %v202_v11 }
 0x12e   :  { %v107_v58 = vadd.f32 %v621_v49, %v106_v55 }
 0x12f   :  { %v204_v13 = vadd.f32 %v623_v9, %v203_v12 }
 0x130   :  { %v111_v60 = vsel %vm110_vm12, %v621_v49, %v107_v58  ;;  %v604_v58 = vld [vmem:[%s879_s8] ss:$0 sm:$0xff] }
 0x131   :  { %v116_v62 = vsel %vm113_vm13, %v115_v59, %v111_v60 }
 0x132   :  { %v118_v63 = vmul.f32 %v116_v62, %v98_v38 }
 0x134   :  { %v139_v1 = vsel %vm61_vm0, %v118_v63, %v138_v61  ;;  %vm205_vm0 = vweird.f32 %v623_v9 }
 0x135   :  { %v140_v2 = vpack.c.bf16 %v139_v1, %v139_v1  ;;  %v792_v14 = vsel %vm205_vm0, %v623_v9, %v204_v13  ;;  %v586_v9 = vld [vmem:[%s882_s11 + $0x8] sm:$0xff] }
 0x137   :  { %529 = vmatmul.msk.bf16.vlgmr.msra.gmra.mxu0 %vm173_vm14, %v140_v2 }
 0x175   :  { %v256_v53 = vpop.permute.xlu2 %255 }
 0x1b4   :  { %v190_v4 = vpop.f32.mrf.mxu0 }
 0x1b5   :  { %v191_v5 = vadd.f32 %v601_v3, %v190_v4 }
 0x1b7   :  { %v197_v6 = vsel %vm196_vm15, %v191_v5, 0.0 }
 0x1b8   :  { %198 = vadd.xlane.f32.xlu1 %v197_v6  ;;  %v587_v6 = vld [vmem:[%s882_s11 + $0x10] sm:$0xff] }
 0x1bc   :  { %v192_v7 = vpop.f32.mrf.mxu0 }
 0x22b   :  { %v199_v15 = vpop.xlane.xlu1 %198 }
 0x22c   :  { %v207_v16 = vmul.f32 %v792_v14, %v199_v15 }
 0x22e   :  { %v208_v17 = vsub.f32 %v191_v5, %v207_v16  ;;  %v589_v5 = vld [vmem:[%s882_s11 + $0x20] sm:$0xff] }
 0x22f   :  { %413 = vmatpush.bf16.msra.mxu2 %v589_v5 }
 0x230   :  { %v209_v18 = vmul.f32 %v208_v17, %v208_v17 }
 0x232   :  { %v210_v19 = vsel %vm196_vm15, %v209_v18, 0.0 }
 0x233   :  { %211 = vadd.xlane.f32.xlu1 %v210_v19 }
 0x24c   :  { %357 = vrot.lane.b32.xlu1 %v760_v0, %s665_s7  ;;  %v588_v0 = vld [vmem:[%s882_s11 + $0x18] sm:$0xff] }
 0x24d   :  { %414 = vmatpush.bf16.msra.mxu2 %v588_v0 }
 0x251   :  { %415 = vmatpush.bf16.msra.mxu2 %v587_v6 }
 0x255   :  { %416 = vmatpush.bf16.msra.mxu2 %v586_v9 }
 0x259   :  { %417 = vmatpush.bf16.msra.mxu2 %v585_v22 }
 0x2a6   :  { %v212_v25 = vpop.xlane.xlu1 %211 }
 0x2a7   :  { %v213_v26 = vmul.f32 %v212_v25, %v792_v14  ;;  %v591_v25 = vld [vmem:[%s884_s13 + $0x8] sm:$0xff] }
 0x2a8   :  { %453 = vmatpush.bf16.msra.mxu3 %v591_v25 }
 0x2a9   :  { %v214_v27 = vadd.f32 1e-05, %v213_v26 }
 0x2ab   :  { %624 = vrsqrt.f32 %v214_v27  ;;  %vm221_vm3 = vweird.f32 %v214_v27 }
 0x2b1   :  { %v625_v28 = vpop.eup %624 }
 0x2b2   :  { %v216_v29 = vmul.f32 %v625_v28, %v214_v27  ;;  %vm222_vm1 = vweird.f32 %v625_v28 }
 0x2b3   :  { %vm223_vm2 = vmor %vm221_vm3, %vm222_vm1  ;;  %vm406_vm1 = vcmask 654336  }
 0x2b4   :  { %v217_v30 = vmul.f32 %v625_v28, %v216_v29 }
 0x2b6   :  { %v218_v31 = vmul.f32 0.5, %v217_v30 }
 0x2b8   :  { %v219_v32 = vsub.f32 1.5, %v218_v31 }
 0x2ba   :  { %v220_v33 = vmul.f32 %v625_v28, %v219_v32 }
 0x2bc   :  { %v224_v35 = vsel %vm223_vm2, %v625_v28, %v220_v33 }
 0x2bd   :  { %v225_v36 = vmul.f32 %v224_v35, %v208_v17 }
 0x2bf   :  { %v229_v38 = vmul.f32 %v602_v34, %v225_v36 }
 0x2c1   :  { %v233_v40 = vadd.f32 %v603_v37, %v229_v38  ;;  %v358_v38 = vpop.permute.xlu1 %357 }
 0x2c3   :  { %v530_v41 = vmul.f32 -1.442695, %v233_v40 }
 0x2c5   :  { %626 = vpow2.f32 %v530_v41 }
 0x2cb   :  { %v627_v42 = vpop.eup %626 }
 0x2cc   :  { %v237_v43 = vadd.f32 1.0, %v627_v42  ;;  %v590_v42 = vld [vmem:[%s884_s13] sm:$0xff] }
 0x2cd   :  { %454 = vmatpush.bf16.msra.mxu3 %v590_v42 }
 0x2ce   :  { %628 = vrcp.f32 %v237_v43  ;;  %v249_v47 = vand.u32 2147483648, %v237_v43  ;;  %v247_v49 = vand.u32 2147483647, %v237_v43  ;;  %vm243_vm5 = vweird.f32 %v237_v43 }
 0x2d0   :  { %v250_v51 = vor.u32 1.1754944e-38, %v249_v47  ;;  %vm248_vm7 = vcmp.eq.f32.partialorder %v247_v49, 8.507059e+37 }
 0x2d4   :  { %v629_v44 = vpop.eup %628 }
 0x2d5   :  { %v239_v45 = vmul.f32 %v629_v44, %v237_v43  ;;  %vm244_vm4 = vweird.f32 %v629_v44  ;;  %v593_v43 = vld [vmem:[%s886_s15 + $0x8] sm:$0xff] }
 0x2d6   :  { %vm245_vm6 = vmor %vm243_vm5, %vm244_vm4  ;;  %490 = vmatpush.bf16.msrb.mxu3 %v593_v43 }
 0x2d7   :  { %v240_v46 = vsub.f32 1.0, %v239_v45  ;;  %v607_v45 = vld [vmem:[%s883_s12] ss:$0 sm:$0xff]  ;;  %s666_s12 = smov [#allocation2]  }
 0x2d8   :  { %s504_s21 = sshll.u32 %s666_s12, 4  ;;  %s505_s21 = int_to_ptr.vmem [resolvable:$true] %s504_s21 }
 0x2d9   :  { %v241_v48 = vmul.f32 %v629_v44, %v240_v46 }
 0x2db   :  { %v242_v50 = vadd.f32 %v629_v44, %v241_v48 }
 0x2dd   :  { %v246_v52 = vsel %vm245_vm6, %v629_v44, %v242_v50  ;;  %v592_v44 = vld [vmem:[%s886_s15] sm:$0xff] }
 0x2de   :  { %v251_v54 = vsel %vm248_vm7, %v250_v51, %v246_v52  ;;  %491 = vmatpush.bf16.msrb.mxu3 %v592_v44  ;;  %v608_v50 = vld [vmem:[%s885_s14] ss:$0 sm:$0xff] }
 0x2df   :  { %v253_v55 = vmul.f32 %v251_v54, %v233_v40 }
 0x2e1   :  { %v258_v56 = vsel %vm196_vm15, %v253_v55, %v256_v53  ;;  %v609_v55 = vld [vmem:[%s887_s16] ss:$0 sm:$0xff] }
 0x2e2   :  { %v259_v57 = vpack.c.bf16 %v258_v56, %v258_v56 }
 0x2e4   :  { %539 = vmatmul.msk.bf16.vlgmr.msra.gmra.mxu1 %vm284_vm8, %v259_v57 }
 0x361   :  { %v300_v59 = vpop.f32.mrf.mxu1 }
 0x362   :  { %v301_v60 = vadd.f32 %v604_v58, %v300_v59 }
 0x364   :  { %v306_v61 = vsel %vm196_vm15, %v301_v60, 0.0 }
 0x365   :  { %307 = vadd.xlane.f32.xlu2 %v306_v61 }
 0x369   :  { %v302_v62 = vpop.f32.mrf.mxu1 }
 0x3d8   :  { %v308_v63 = vpop.xlane.xlu2 %307 }
 0x3d9   :  { %v309_v1 = vmul.f32 %v308_v63, %v792_v14 }
 0x3db   :  { %v310_v2 = vsub.f32 %v301_v60, %v309_v1 }
 0x3dd   :  { %v311_v3 = vmul.f32 %v310_v2, %v310_v2 }
 0x3df   :  { %v312_v4 = vsel %vm196_vm15, %v311_v3, 0.0 }
 0x3e0   :  { %313 = vadd.xlane.f32.xlu0 %v312_v4 }
 0x453   :  { %v314_v7 = vpop.xlane.xlu0 %313 }
 0x454   :  { %v315_v8 = vmul.f32 %v314_v7, %v792_v14  ;;  %v605_v14 = vld [vmem:[%s880_s9] ss:$0 sm:$0xff] }
 0x456   :  { %v316_v10 = vadd.f32 1e-05, %v315_v8 }
 0x458   :  { %630 = vrsqrt.f32 %v316_v10  ;;  %vm323_vm10 = vweird.f32 %v316_v10 }
 0x45e   :  { %v631_v11 = vpop.eup %630 }
 0x45f   :  { %v318_v12 = vmul.f32 %v631_v11, %v316_v10  ;;  %vm324_vm9 = vweird.f32 %v631_v11 }
 0x460   :  { %vm325_vm11 = vmor %vm323_vm10, %vm324_vm9 }
 0x461   :  { %v319_v13 = vmul.f32 %v631_v11, %v318_v12 }
 0x463   :  { %v320_v15 = vmul.f32 0.5, %v319_v13 }
 0x465   :  { %v321_v16 = vsub.f32 1.5, %v320_v15 }
 0x467   :  { %v322_v17 = vmul.f32 %v631_v11, %v321_v16 }
 0x469   :  { %v326_v18 = vsel %vm325_vm11, %v631_v11, %v322_v17 }
 0x46a   :  { %v327_v19 = vmul.f32 %v326_v18, %v310_v2 }
 0x46c   :  { %v331_v21 = vmul.f32 %v605_v14, %v327_v19 }
 0x46e   :  { %v335_v23 = vadd.f32 %v606_v20, %v331_v21 }
 0x470   :  { %v540_v24 = vmul.f32 -1.442695, %v335_v23 }
 0x472   :  { %632 = vpow2.f32 %v540_v24 }
 0x478   :  { %v633_v26 = vpop.eup %632 }
 0x479   :  { %v339_v27 = vadd.f32 1.0, %v633_v26 }
 0x47b   :  { %634 = vrcp.f32 %v339_v27  ;;  %v351_v31 = vand.u32 2147483648, %v339_v27  ;;  %v349_v33 = vand.u32 2147483647, %v339_v27  ;;  %vm345_vm13 = vweird.f32 %v339_v27 }
 0x47d   :  { %v352_v35 = vor.u32 1.1754944e-38, %v351_v31  ;;  %vm350_vm0 = vcmp.eq.f32.partialorder %v349_v33, 8.507059e+37 }
 0x481   :  { %v635_v28 = vpop.eup %634 }
 0x482   :  { %v341_v29 = vmul.f32 %v635_v28, %v339_v27  ;;  %vm346_vm12 = vweird.f32 %v635_v28 }
 0x483   :  { %vm347_vm14 = vmor %vm345_vm13, %vm346_vm12 }
 0x484   :  { %v342_v30 = vsub.f32 1.0, %v341_v29 }
 0x486   :  { %v343_v32 = vmul.f32 %v635_v28, %v342_v30 }
 0x488   :  { %v344_v34 = vadd.f32 %v635_v28, %v343_v32 }
 0x48a   :  { %v348_v36 = vsel %vm347_vm14, %v635_v28, %v344_v34 }
 0x48b   :  { %v353_v37 = vsel %vm350_vm0, %v352_v35, %v348_v36 }
 0x48c   :  { %v355_v39 = vmul.f32 %v353_v37, %v335_v23 }
 0x48e   :  { %v360_v40 = vsel %vm196_vm15, %v355_v39, %v358_v38 }
 0x48f   :  { %v361_v41 = vpack.c.bf16 %v360_v40, %v360_v40 }
 0x491   :  { %561 = vmatmul.msk.bf16.vlgmr.msra.gmra.mxu2 %vm406_vm1, %v361_v41 }
 0x514   :  { %v419_v46 = vpop.f32.mrf.mxu2 }
 0x515   :  { %v420_v47 = vadd.f32 %v607_v45, %v419_v46 }
 0x517   :  { %v423_v48 = vpack.c.bf16 %v420_v47, %v420_v47 }
 0x519   :  { %570 = vmatmul.msk.bf16.vlgmr.msra.gmra.mxu3 %vm196_vm15, %v423_v48 }
 0x51c   :  { %v421_v49 = vpop.f32.mrf.mxu2 }
 0x59c   :  { %v456_v51 = vpop.f32.mrf.mxu3 }
 0x59d   :  { %v457_v52 = vadd.f32 %v608_v50, %v456_v51 }
 0x59f   :  { %v460_v53 = vpack.c.bf16 %v457_v52, %v457_v52 }
 0x5a1   :  { %579 = vmatmul.msk.bf16.vlgmr.msrb.gmra.mxu3 %vm196_vm15, %v460_v53 }
 0x5a4   :  { %v458_v54 = vpop.f32.mrf.mxu3 }
 0x624   :  { %v493_v56 = vpop.f32.mrf.mxu3 }
 0x625   :  { %v494_v57 = vadd.f32 %v609_v55, %v493_v56 }
 0x627   :  { %v497_v58 = vadd.f32 %v494_v57, %v420_v47 }
 0x629   :  { %498 = vst.msk [vmem:[#allocation2] sm:$0xff] %vm196_vm15, %v497_v58 }
 0x62a   :  { %509 = dma.vmem_to_hbm [thread:$0]  %s505_s21, 128, %s507_s3, [#allocation3]  }
 0x62c   :  { %v495_v59 = vpop.f32.mrf.mxu3 }
 0x62d   :  { %660 = dma.done.wait [#allocation3], 128  }
 0x62e   :  { %661 = vsyncadd [#allocation3], 4294967168 }
 0x62f   :  { %514 = vsyncpa [#allocation3], 1 }

// kernel: tpu_custom_call.1
= control target key start
LH: loop header
LB: loop body
LE: loop exit
PB: predicated region body
PF: predicated region fallthrough
CT: control target
= control target key end

     0   :  { %s871_s0 = inlined_call_operand.vmem [shape: f32[8,64], index: 0, kind: input, shape index: {}]   ;;  %s872_s1 = inlined_call_operand.vmem [shape: f32[1,48], index: 1, kind: input, shape index: {}]   ;;  %s873_s2 = inlined_call_operand.vmem [shape: f32[1,48], index: 2, kind: input, shape index: {}]   ;;  %s874_s3 = inlined_call_operand.vmem [shape: bf16[56,32], index: 3, kind: input, shape index: {}]   ;;  %s875_s4 = inlined_call_operand.vmem [shape: f32[1,32], index: 4, kind: input, shape index: {}]   ;;  %s876_s5 = inlined_call_operand.vmem [shape: f32[1,32], index: 5, kind: input, shape index: {}]   ;;  %s877_s6 = inlined_call_operand.vmem [shape: f32[1,32], index: 6, kind: input, shape index: {}]   ;;  %s878_s7 = inlined_call_operand.vmem [shape: bf16[40,32], index: 7, kind: input, shape index: {}]   ;;  %s879_s8 = inlined_call_operand.vmem [shape: f32[1,32], index: 8, kind: input, shape index: {}]   ;;  %s880_s9 = inlined_call_operand.vmem [shape: f32[1,32], index: 9, kind: input, shape index: {}]   ;;  %s881_s10 = inlined_call_operand.vmem [shape: f32[1,32], index: 10, kind: input, shape index: {}]   ;;  %s882_s11 = inlined_call_operand.vmem [shape: bf16[80,32], index: 11, kind: input, shape index: {}]   ;;  %s883_s12 = inlined_call_operand.vmem [shape: f32[1,32], index: 12, kind: input, shape index: {}]   ;;  %s884_s13 = inlined_call_operand.vmem [shape: bf16[32,32], index: 13, kind: input, shape index: {}]   ;;  %s885_s14 = inlined_call_operand.vmem [shape: f32[1,32], index: 14, kind: input, shape index: {}]   ;;  %s886_s15 = inlined_call_operand.vmem [shape: bf16[32,32], index: 15, kind: input, shape index: {}]   ;;  %s887_s16 = inlined_call_operand.vmem [shape: f32[1,32], index: 16, kind: input, shape index: {}]   ;;  %s888_s17 = inlined_call_operand.hbm [shape: f32[8,32], index: 17, kind: output, shape index: {}]  }
   0x1   :  { %889 = sst [smem:[#allocation5_spill]] %s871_s0 }
   0x2   :  { %890 = sst [smem:[#allocation6_spill]] %s872_s1 }
   0x3   :  { %s891_s26 = sld [smem:[#allocation5_spill]]  ;;  %vm61_vm0 = vcmask 392192  }
   0x9   :  { %v760_v0 = vld [vmem:[%s891_s26] sm:$0xff] }
   0xa   :  { %v62_v1 = vsel %vm61_vm0, %v760_v0, 0.0 }
   0xb   :  { %63 = vadd.xlane.f32.xlu0 %v62_v1 }
   0xc   :  { %22 = vsyncpa [#allocation3], 0  ;;  %v662_v2 = vmov 48.0   ;;  %v147_v14 = vld [vmem:[%s874_s3 + $0x18] sm:$0xf]  ;;  %vm177_vm2 = vcmask 1043456  }
   0xd   :  { %610 = vrcp.f32 %v662_v2  ;;  %v165_v15 = vunpack.c.l.b16 %v147_v14  ;;  %v582_v18 = vld [vmem:[%s874_s3 + $0x10] sm:$0xff]  ;;  %v581_v22 = vld [vmem:[%s874_s3 + $0x8] sm:$0xff]  ;;  %v516_v23 = vmul.f32 -1.442695, %v760_v0  ;;  %v580_v24 = vld [vmem:[%s874_s3] sm:$0xff]  ;;  %s892_s22 = sld [smem:[#allocation6_spill]] }
   0xe   :  { %v600_v36 = vld [vmem:[%s873_s2] ss:$0 sm:$0xff]  ;;  %vm173_vm14 = vcmask 457728   ;;  %vm196_vm15 = vcmask 261120   ;;  %s663_s25 = smov 104   ;;  %s506_s3 = sshll.u32 %s888_s17, 4  ;;  %s507_s3 = int_to_ptr.hbm [resolvable:$true] %s506_s3 }
   0xf   :  { %v169_v16 = vpack.c.b16 %v165_v15, %v165_v15 }
  0x11   :  { %v179_v17 = vsel %vm177_vm2, %v169_v16, 0 }
  0x12   :  { %185 = vmatpush.bf16.msra.mxu0 %v179_v17 }
  0x13   :  { %v611_v3 = vpop.eup %610  ;;  %v599_v33 = vld [vmem:[%s892_s22] ss:$0 sm:$0xff] }
  0x14   :  { %v66_v4 = vmul.f32 48.0, %v611_v3  ;;  %vm70_vm1 = vweird.f32 %v611_v3 }
  0x16   :  { %v67_v5 = vsub.f32 1.0, %v66_v4  ;;  %186 = vmatpush.bf16.msra.mxu0 %v582_v18 }
  0x18   :  { %v68_v6 = vmul.f32 %v611_v3, %v67_v5 }
  0x1a   :  { %v69_v7 = vadd.f32 %v611_v3, %v68_v6  ;;  %187 = vmatpush.bf16.msra.mxu0 %v581_v22 }
  0x1c   :  { %v71_v8 = vsel %vm70_vm1, %v611_v3, %v69_v7  ;;  %v601_v3 = vld [vmem:[%s875_s4] ss:$0 sm:$0xff] }
  0x1e   :  { %188 = vmatpush.bf16.msra.mxu0 %v580_v24  ;;  %v584_v24 = vld [vmem:[%s878_s7 + $0x8] sm:$0xff] }
  0x7e   :  { %v64_v9 = vpop.xlane.xlu0 %63 }
  0x7f   :  { %v72_v10 = vmul.f32 %v71_v8, %v64_v9 }
  0x81   :  { %v73_v11 = vsub.f32 %v760_v0, %v72_v10 }
  0x83   :  { %v74_v12 = vmul.f32 %v73_v11, %v73_v11 }
  0x85   :  { %v75_v13 = vsel %vm61_vm0, %v74_v12, 0.0 }
  0x86   :  { %76 = vadd.xlane.f32.xlu0 %v75_v13 }
  0xf9   :  { %v77_v19 = vpop.xlane.xlu0 %76 }
  0xfa   :  { %v78_v20 = vmul.f32 %v77_v19, %v71_v8  ;;  %v664_v8 = vmov 32.0  }
  0xfc   :  { %v79_v21 = vadd.f32 1e-05, %v78_v20  ;;  %v264_v20 = vld [vmem:[%s878_s7 + $0x10] sm:$0xf] }
  0xfe   :  { %612 = vrsqrt.f32 %v79_v21  ;;  %vm86_vm4 = vweird.f32 %v79_v21 }
  0xff   :  { %614 = vpow2.f32 %v516_v23 }
 0x104   :  { %v613_v25 = vpop.eup %612 }
 0x105   :  { %v81_v26 = vmul.f32 %v613_v25, %v79_v21  ;;  %v615_v29 = vpop.eup %614  ;;  %vm87_vm3 = vweird.f32 %v613_v25  ;;  %v278_v21 = vunpack.c.l.b16 %v264_v20  ;;  %v606_v20 = vld [vmem:[%s881_s10] ss:$0 sm:$0xff] }
 0x106   :  { %v122_v31 = vadd.f32 1.0, %v615_v29  ;;  %vm88_vm5 = vmor %vm86_vm4, %vm87_vm3 }
 0x107   :  { %v82_v27 = vmul.f32 %v613_v25, %v81_v26  ;;  %v281_v22 = vpack.c.b16 %v278_v21, %v278_v21 }
 0x108   :  { %616 = vrcp.f32 %v122_v31  ;;  %vm128_vm6 = vweird.f32 %v122_v31  ;;  %v134_v46 = vand.u32 2147483648, %v122_v31  ;;  %v132_v48 = vand.u32 2147483647, %v122_v31 }
 0x109   :  { %v83_v28 = vmul.f32 0.5, %v82_v27  ;;  %v289_v23 = vsel %vm177_vm2, %v281_v22, 0  ;;  %v585_v22 = vld [vmem:[%s882_s11] sm:$0xff] }
 0x10a   :  { %v135_v51 = vor.u32 1.1754944e-38, %v134_v46  ;;  %vm133_vm9 = vcmp.eq.f32.partialorder %v132_v48, 8.507059e+37  ;;  %296 = vmatpush.bf16.msra.mxu1 %v289_v23 }
 0x10b   :  { %v84_v30 = vsub.f32 1.5, %v83_v28 }
 0x10d   :  { %v85_v32 = vmul.f32 %v613_v25, %v84_v30 }
 0x10e   :  { %v617_v40 = vpop.eup %616  ;;  %297 = vmatpush.bf16.msra.mxu1 %v584_v24 }
 0x10f   :  { %v89_v34 = vsel %vm88_vm5, %v613_v25, %v85_v32  ;;  %v124_v41 = vmul.f32 %v617_v40, %v122_v31  ;;  %vm129_vm7 = vweird.f32 %v617_v40 }
 0x110   :  { %v90_v35 = vmul.f32 %v89_v34, %v73_v11  ;;  %vm130_vm8 = vmor %vm128_vm6, %vm129_vm7  ;;  %v602_v34 = vld [vmem:[%s876_s5] ss:$0 sm:$0xff] }
 0x111   :  { %v125_v43 = vsub.f32 1.0, %v124_v41 }
 0x112   :  { %v94_v37 = vmul.f32 %v599_v33, %v90_v35 }
 0x113   :  { %v126_v45 = vmul.f32 %v617_v40, %v125_v43 }
 0x114   :  { %v98_v38 = vadd.f32 %v600_v36, %v94_v37  ;;  %v603_v37 = vld [vmem:[%s877_s6] ss:$0 sm:$0xff] }
 0x115   :  { %v127_v47 = vadd.f32 %v617_v40, %v126_v45 }
 0x116   :  { %v515_v39 = vmul.f32 -1.442695, %v98_v38 }
 0x117   :  { %v131_v53 = vsel %vm130_vm8, %v617_v40, %v127_v47  ;;  %vm284_vm8 = vcmask 326656  }
 0x118   :  { %618 = vpow2.f32 %v515_v39  ;;  %v136_v57 = vsel %vm133_vm9, %v135_v51, %v131_v53  ;;  %v583_v39 = vld [vmem:[%s878_s7] sm:$0xff]  ;;  %s665_s7 = smov 32  }
 0x119   :  { %v138_v61 = vmul.f32 %v136_v57, %v760_v0  ;;  %298 = vmatpush.bf16.msra.mxu1 %v583_v39 }
 0x11b   :  { %255 = vrot.lane.b32.xlu2 %v138_v61, %s663_s25 }
 0x11e   :  { %v619_v42 = vpop.eup %618 }
 0x11f   :  { %v102_v44 = vadd.f32 1.0, %v619_v42 }
 0x121   :  { %620 = vrcp.f32 %v102_v44  ;;  %v114_v54 = vand.u32 2147483648, %v102_v44  ;;  %v112_v56 = vand.u32 2147483647, %v102_v44  ;;  %vm108_vm11 = vweird.f32 %v102_v44 }
 0x122   :  { %622 = vrcp.f32 %v664_v8 }
 0x123   :  { %v115_v59 = vor.u32 1.1754944e-38, %v114_v54  ;;  %vm113_vm13 = vcmp.eq.f32.partialorder %v112_v56, 8.507059e+37 }
 0x127   :  { %v621_v49 = vpop.eup %620 }
 0x128   :  { %v104_v50 = vmul.f32 %v621_v49, %v102_v44  ;;  %vm109_vm10 = vweird.f32 %v621_v49  ;;  %v623_v9 = vpop.eup %622 }
 0x129   :  { %vm110_vm12 = vmor %vm108_vm11, %vm109_vm10  ;;  %v201_v10 = vmul.f32 32.0, %v623_v9 }
 0x12a   :  { %v105_v52 = vsub.f32 1.0, %v104_v50 }
 0x12b   :  { %v202_v11 = vsub.f32 1.0, %v201_v10 }
 0x12c   :  { %v106_v55 = vmul.f32 %v621_v49, %v105_v52 }
 0x12d   :  { %v203_v12 = vmul.f32 %v623_v9, %v202_v11 }
 0x12e   :  { %v107_v58 = vadd.f32 %v621_v49, %v106_v55 }
 0x12f   :  { %v204_v13 = vadd.f32 %v623_v9, %v203_v12 }
 0x130   :  { %v111_v60 = vsel %vm110_vm12, %v621_v49, %v107_v58  ;;  %v604_v58 = vld [vmem:[%s879_s8] ss:$0 sm:$0xff] }
 0x131   :  { %v116_v62 = vsel %vm113_vm13, %v115_v59, %v111_v60 }
 0x132   :  { %v118_v63 = vmul.f32 %v116_v62, %v98_v38 }
 0x134   :  { %v139_v1 = vsel %vm61_vm0, %v118_v63, %v138_v61  ;;  %vm205_vm0 = vweird.f32 %v623_v9 }
 0x135   :  { %v140_v2 = vpack.c.bf16 %v139_v1, %v139_v1  ;;  %v792_v14 = vsel %vm205_vm0, %v623_v9, %v204_v13  ;;  %v586_v9 = vld [vmem:[%s882_s11 + $0x8] sm:$0xff] }
 0x137   :  { %529 = vmatmul.msk.bf16.vlgmr.msra.gmra.mxu0 %vm173_vm14, %v140_v2 }
 0x175   :  { %v256_v53 = vpop.permute.xlu2 %255 }
 0x1b4   :  { %v190_v4 = vpop.f32.mrf.mxu0 }
 0x1b5   :  { %v191_v5 = vadd.f32 %v601_v3, %v190_v4 }
 0x1b7   :  { %v197_v6 = vsel %vm196_vm15, %v191_v5, 0.0 }
 0x1b8   :  { %198 = vadd.xlane.f32.xlu1 %v197_v6  ;;  %v587_v6 = vld [vmem:[%s882_s11 + $0x10] sm:$0xff] }
 0x1bc   :  { %v192_v7 = vpop.f32.mrf.mxu0 }
 0x22b   :  { %v199_v15 = vpop.xlane.xlu1 %198 }
 0x22c   :  { %v207_v16 = vmul.f32 %v792_v14, %v199_v15 }
 0x22e   :  { %v208_v17 = vsub.f32 %v191_v5, %v207_v16  ;;  %v589_v5 = vld [vmem:[%s882_s11 + $0x20] sm:$0xff] }
 0x22f   :  { %413 = vmatpush.bf16.msra.mxu2 %v589_v5 }
 0x230   :  { %v209_v18 = vmul.f32 %v208_v17, %v208_v17 }
 0x232   :  { %v210_v19 = vsel %vm196_vm15, %v209_v18, 0.0 }
 0x233   :  { %211 = vadd.xlane.f32.xlu1 %v210_v19 }
 0x24c   :  { %357 = vrot.lane.b32.xlu1 %v760_v0, %s665_s7  ;;  %v588_v0 = vld [vmem:[%s882_s11 + $0x18] sm:$0xff] }
 0x24d   :  { %414 = vmatpush.bf16.msra.mxu2 %v588_v0 }
 0x251   :  { %415 = vmatpush.bf16.msra.mxu2 %v587_v6 }
 0x255   :  { %416 = vmatpush.bf16.msra.mxu2 %v586_v9 }
 0x259   :  { %417 = vmatpush.bf16.msra.mxu2 %v585_v22 }
 0x2a6   :  { %v212_v25 = vpop.xlane.xlu1 %211 }
 0x2a7   :  { %v213_v26 = vmul.f32 %v212_v25, %v792_v14  ;;  %v591_v25 = vld [vmem:[%s884_s13 + $0x8] sm:$0xff] }
 0x2a8   :  { %453 = vmatpush.bf16.msra.mxu3 %v591_v25 }
 0x2a9   :  { %v214_v27 = vadd.f32 1e-05, %v213_v26 }
 0x2ab   :  { %624 = vrsqrt.f32 %v214_v27  ;;  %vm221_vm3 = vweird.f32 %v214_v27 }
 0x2b1   :  { %v625_v28 = vpop.eup %624 }
 0x2b2   :  { %v216_v29 = vmul.f32 %v625_v28, %v214_v27  ;;  %vm222_vm1 = vweird.f32 %v625_v28 }
 0x2b3   :  { %vm223_vm2 = vmor %vm221_vm3, %vm222_vm1  ;;  %vm406_vm1 = vcmask 654336  }
 0x2b4   :  { %v217_v30 = vmul.f32 %v625_v28, %v216_v29 }
 0x2b6   :  { %v218_v31 = vmul.f32 0.5, %v217_v30 }
 0x2b8   :  { %v219_v32 = vsub.f32 1.5, %v218_v31 }
 0x2ba   :  { %v220_v33 = vmul.f32 %v625_v28, %v219_v32 }
 0x2bc   :  { %v224_v35 = vsel %vm223_vm2, %v625_v28, %v220_v33 }
 0x2bd   :  { %v225_v36 = vmul.f32 %v224_v35, %v208_v17 }
 0x2bf   :  { %v229_v38 = vmul.f32 %v602_v34, %v225_v36 }
 0x2c1   :  { %v233_v40 = vadd.f32 %v603_v37, %v229_v38  ;;  %v358_v38 = vpop.permute.xlu1 %357 }
 0x2c3   :  { %v530_v41 = vmul.f32 -1.442695, %v233_v40 }
 0x2c5   :  { %626 = vpow2.f32 %v530_v41 }
 0x2cb   :  { %v627_v42 = vpop.eup %626 }
 0x2cc   :  { %v237_v43 = vadd.f32 1.0, %v627_v42  ;;  %v590_v42 = vld [vmem:[%s884_s13] sm:$0xff] }
 0x2cd   :  { %454 = vmatpush.bf16.msra.mxu3 %v590_v42 }
 0x2ce   :  { %628 = vrcp.f32 %v237_v43  ;;  %v249_v47 = vand.u32 2147483648, %v237_v43  ;;  %v247_v49 = vand.u32 2147483647, %v237_v43  ;;  %vm243_vm5 = vweird.f32 %v237_v43 }
 0x2d0   :  { %v250_v51 = vor.u32 1.1754944e-38, %v249_v47  ;;  %vm248_vm7 = vcmp.eq.f32.partialorder %v247_v49, 8.507059e+37 }
 0x2d4   :  { %v629_v44 = vpop.eup %628 }
 0x2d5   :  { %v239_v45 = vmul.f32 %v629_v44, %v237_v43  ;;  %vm244_vm4 = vweird.f32 %v629_v44  ;;  %v593_v43 = vld [vmem:[%s886_s15 + $0x8] sm:$0xff] }
 0x2d6   :  { %vm245_vm6 = vmor %vm243_vm5, %vm244_vm4  ;;  %490 = vmatpush.bf16.msrb.mxu3 %v593_v43 }
 0x2d7   :  { %v240_v46 = vsub.f32 1.0, %v239_v45  ;;  %v607_v45 = vld [vmem:[%s883_s12] ss:$0 sm:$0xff]  ;;  %s666_s12 = smov [#allocation2]  }
 0x2d8   :  { %s504_s21 = sshll.u32 %s666_s12, 4  ;;  %s505_s21 = int_to_ptr.vmem [resolvable:$true] %s504_s21 }
 0x2d9   :  { %v241_v48 = vmul.f32 %v629_v44, %v240_v46 }
 0x2db   :  { %v242_v50 = vadd.f32 %v629_v44, %v241_v48 }
 0x2dd   :  { %v246_v52 = vsel %vm245_vm6, %v629_v44, %v242_v50  ;;  %v592_v44 = vld [vmem:[%s886_s15] sm:$0xff] }
 0x2de   :  { %v251_v54 = vsel %vm248_vm7, %v250_v51, %v246_v52  ;;  %491 = vmatpush.bf16.msrb.mxu3 %v592_v44  ;;  %v608_v50 = vld [vmem:[%s885_s14] ss:$0 sm:$0xff] }
 0x2df   :  { %v253_v55 = vmul.f32 %v251_v54, %v233_v40 }
 0x2e1   :  { %v258_v56 = vsel %vm196_vm15, %v253_v55, %v256_v53  ;;  %v609_v55 = vld [vmem:[%s887_s16] ss:$0 sm:$0xff] }
 0x2e2   :  { %v259_v57 = vpack.c.bf16 %v258_v56, %v258_v56 }
 0x2e4   :  { %539 = vmatmul.msk.bf16.vlgmr.msra.gmra.mxu1 %vm284_vm8, %v259_v57 }
 0x361   :  { %v300_v59 = vpop.f32.mrf.mxu1 }
 0x362   :  { %v301_v60 = vadd.f32 %v604_v58, %v300_v59 }
 0x364   :  { %v306_v61 = vsel %vm196_vm15, %v301_v60, 0.0 }
 0x365   :  { %307 = vadd.xlane.f32.xlu2 %v306_v61 }
 0x369   :  { %v302_v62 = vpop.f32.mrf.mxu1 }
 0x3d8   :  { %v308_v63 = vpop.xlane.xlu2 %307 }
 0x3d9   :  { %v309_v1 = vmul.f32 %v308_v63, %v792_v14 }
 0x3db   :  { %v310_v2 = vsub.f32 %v301_v60, %v309_v1 }
 0x3dd   :  { %v311_v3 = vmul.f32 %v310_v2, %v310_v2 }
 0x3df   :  { %v312_v4 = vsel %vm196_vm15, %v311_v3, 0.0 }
 0x3e0   :  { %313 = vadd.xlane.f32.xlu0 %v312_v4 }
 0x453   :  { %v314_v7 = vpop.xlane.xlu0 %313 }
 0x454   :  { %v315_v8 = vmul.f32 %v314_v7, %v792_v14  ;;  %v605_v14 = vld [vmem:[%s880_s9] ss:$0 sm:$0xff] }
 0x456   :  { %v316_v10 = vadd.f32 1e-05, %v315_v8 }
 0x458   :  { %630 = vrsqrt.f32 %v316_v10  ;;  %vm323_vm10 = vweird.f32 %v316_v10 }
 0x45e   :  { %v631_v11 = vpop.eup %630 }
 0x45f   :  { %v318_v12 = vmul.f32 %v631_v11, %v316_v10  ;;  %vm324_vm9 = vweird.f32 %v631_v11 }
 0x460   :  { %vm325_vm11 = vmor %vm323_vm10, %vm324_vm9 }
 0x461   :  { %v319_v13 = vmul.f32 %v631_v11, %v318_v12 }
 0x463   :  { %v320_v15 = vmul.f32 0.5, %v319_v13 }
 0x465   :  { %v321_v16 = vsub.f32 1.5, %v320_v15 }
 0x467   :  { %v322_v17 = vmul.f32 %v631_v11, %v321_v16 }
 0x469   :  { %v326_v18 = vsel %vm325_vm11, %v631_v11, %v322_v17 }
 0x46a   :  { %v327_v19 = vmul.f32 %v326_v18, %v310_v2 }
 0x46c   :  { %v331_v21 = vmul.f32 %v605_v14, %v327_v19 }
 0x46e   :  { %v335_v23 = vadd.f32 %v606_v20, %v331_v21 }
 0x470   :  { %v540_v24 = vmul.f32 -1.442695, %v335_v23 }
 0x472   :  { %632 = vpow2.f32 %v540_v24 }
 0x478   :  { %v633_v26 = vpop.eup %632 }
 0x479   :  { %v339_v27 = vadd.f32 1.0, %v633_v26 }
 0x47b   :  { %634 = vrcp.f32 %v339_v27  ;;  %v351_v31 = vand.u32 2147483648, %v339_v27  ;;  %v349_v33 = vand.u32 2147483647, %v339_v27  ;;  %vm345_vm13 = vweird.f32 %v339_v27 }
 0x47d   :  { %v352_v35 = vor.u32 1.1754944e-38, %v351_v31  ;;  %vm350_vm0 = vcmp.eq.f32.partialorder %v349_v33, 8.507059e+37 }
 0x481   :  { %v635_v28 = vpop.eup %634 }
 0x482   :  { %v341_v29 = vmul.f32 %v635_v28, %v339_v27  ;;  %vm346_vm12 = vweird.f32 %v635_v28 }
 0x483   :  { %vm347_vm14 = vmor %vm345_vm13, %vm346_vm12 }
 0x484   :  { %v342_v30 = vsub.f32 1.0, %v341_v29 }
 0x486   :  { %v343_v32 = vmul.f32 %v635_v28, %v342_v30 }
 0x488   :  { %v344_v34 = vadd.f32 %v635_v28, %v343_v32 }
 0x48a   :  { %v348_v36 = vsel %vm347_vm14, %v635_v28, %v344_v34 }
 0x48b   :  { %v353_v37 = vsel %vm350_vm0, %v352_v35, %v348_v36 }
 0x48c   :  { %v355_v39 = vmul.f32 %v353_v37, %v335_v23 }
 0x48e   :  { %v360_v40 = vsel %vm196_vm15, %v355_v39, %v358_v38 }
 0x48f   :  { %v361_v41 = vpack.c.bf16 %v360_v40, %v360_v40 }
 0x491   :  { %561 = vmatmul.msk.bf16.vlgmr.msra.gmra.mxu2 %vm406_vm1, %v361_v41 }
 0x514   :  { %v419_v46 = vpop.f32.mrf.mxu2 }
 0x515   :  { %v420_v47 = vadd.f32 %v607_v45, %v419_v46 }
 0x517   :  { %v423_v48 = vpack.c.bf16 %v420_v47, %v420_v47 }
 0x519   :  { %570 = vmatmul.msk.bf16.vlgmr.msra.gmra.mxu3 %vm196_vm15, %v423_v48 }
 0x51c   :  { %v421_v49 = vpop.f32.mrf.mxu2 }
 0x59c   :  { %v456_v51 = vpop.f32.mrf.mxu3 }
 0x59d   :  { %v457_v52 = vadd.f32 %v608_v50, %v456_v51 }
 0x59f   :  { %v460_v53 = vpack.c.bf16 %v457_v52, %v457_v52 }
 0x5a1   :  { %579 = vmatmul.msk.bf16.vlgmr.msrb.gmra.mxu3 %vm196_vm15, %v460_v53 }
 0x5a4   :  { %v458_v54 = vpop.f32.mrf.mxu3 }
 0x624   :  { %v493_v56 = vpop.f32.mrf.mxu3 }
 0x625   :  { %v494_v57 = vadd.f32 %v609_v55, %v493_v56 }
 0x627   :  { %v497_v58 = vadd.f32 %v494_v57, %v420_v47 }
 0x629   :  { %498 = vst.msk [vmem:[#allocation2] sm:$0xff] %vm196_vm15, %v497_v58 }
 0x62a   :  { %509 = dma.vmem_to_hbm [thread:$0]  %s505_s21, 128, %s507_s3, [#allocation3]  }
 0x62c   :  { %v495_v59 = vpop.f32.mrf.mxu3 }
 0x62d   :  { %660 = dma.done.wait [#allocation3], 128  }
 0x62e   :  { %661 = vsyncadd [#allocation3], 4294967168 }
 0x62f   :  { %514 = vsyncpa [#allocation3], 1 }

</bundles_post_ra>
